<compile_context>
chip_gen: v6e
topology: v6e:2x2x1
jax: 0.10.0
libtpu: 0.0.40
codegen_flags: <defaults>
</compile_context>

<pallas_src>
import functools

import jax
import jax.numpy as jnp
from jax.experimental import pallas as pl
from jax.experimental.pallas import tpu as pltpu


# ----------------------------------------------------------------------------
# Fused Pallas kernel
# ----------------------------------------------------------------------------
def _cnn2d_fused_kernel(x_ref, masks_ref,
                        w1_ref, s1_ref, b1_ref,
                        w2_ref, s2_ref, b2_ref,
                        fc1_hbm_ref, s3_ref, b3_ref,
                        wfc2_ref, bfc2_ref,
                        out_ref,
                        fc1_vmem, dma_sem,
                        *, N, H, W, KH, KW, CH_GROUP):
    """Whole CNN_2d forward (eval mode) on one grid step.

    x_ref      : (Cin, N*H*W)        input, spatial flattened on the lane axis
    masks_ref  : (KH*KW, N*H*W)      precomputed 0/1 halo-validity masks
    w1_ref     : (C1, KH*KW*Cin)     conv1 weights, tap-major / channel-minor
    w2_ref     : (KH, C2, KW*C1)     conv2 weights, one dense slab per tap row
    s*/b*      : folded BatchNorm (+conv/linear bias) scale / shift
    fc1_hbm_ref: (C2/G, G*H*W, 128)  bf16 fc1 weights, left in HBM (pl.ANY)
    wfc2_ref   : (128, out_dim)      f32 (padded rows zero)
    out_ref    : (N, out_dim)
    fc1_vmem   : VMEM scratch, same shape/dtype as fc1_hbm_ref
    dma_sem    : DMA semaphore for the fc1 weight fetch
    """
    HW = H * W
    NP = N * HW
    C2 = w2_ref.shape[1]
    G = CH_GROUP

    # --- Start the fc1 weight fetch immediately (~95% of all HBM traffic);
    # it overlaps conv1 / conv2 / patch construction below.
    fc1_copy = pltpu.make_async_copy(fc1_hbm_ref, fc1_vmem, dma_sem)
    fc1_copy.start()

    # --- Tap masks (precomputed on the host, loaded once, reused by both convs).
    masks = masks_ref[...]                                   # (KH*KW, NP) f32

    def tap_rows(act, ki, kj):
        """(C, NP) -> (C, NP): activation shifted to tap (ki,kj), halo zeroed."""
        di = ki - (KH - 1) // 2
        dj = kj - (KW - 1) // 2
        s = di * W + dj
        shifted = act if s == 0 else pltpu.roll(act, shift=(-s) % NP, axis=1)
        t = ki * KW + kj
        return shifted * masks[t:t + 1, :]

    # --- conv1 + folded BN + ReLU: one K = KH*KW*Cin MXU contraction.
    x = x_ref[...]                                           # (Cin, NP)
    p1 = jnp.concatenate(
        [tap_rows(x, ki, kj) for ki in range(KH) for kj in range(KW)], axis=0)
    y1 = jnp.dot(w1_ref[...], p1, preferred_element_type=jnp.float32)
    y1 = jnp.maximum(y1 * s1_ref[...] + b1_ref[...], 0.0)    # (C1, NP)

    # --- conv2 + folded BN + ReLU, accumulated over KH tap groups so the live
    # patch matrix never exceeds (KW*C1, NP) (vreg-pressure cap).
    y2 = None
    for ki in range(KH):
        pg = jnp.concatenate([tap_rows(y1, ki, kj) for kj in range(KW)], axis=0)
        part = jnp.dot(w2_ref[ki], pg, preferred_element_type=jnp.float32)
        y2 = part if y2 is None else y2 + part
    y2 = jnp.maximum(y2 * s2_ref[...] + b2_ref[...], 0.0)    # (C2, NP)

    # --- fc1 + folded BN1d + ReLU.  The PyTorch flatten (N, C2*H*W) is realized
    # with register-level slices/concats of y2 (no scatter stores, no VMEM
    # scratch round-trip): channel-group g supplies lhs lane block u*HW + p,
    # matching the fc1 weight layout chosen at init.  bf16 weights, f32 acc.
    fc1_copy.wait()
    h = None
    for g in range(C2 // G):
        rows = []
        for n in range(N):
            pieces = [y2[g * G + u:g * G + u + 1, n * HW:(n + 1) * HW]
                      for u in range(G)]
            rows.append(jnp.concatenate(pieces, axis=1))      # (1, G*HW)
        lhs = jnp.concatenate(rows, axis=0)                   # (N, G*HW)
        part = jnp.dot(lhs.astype(fc1_vmem.dtype), fc1_vmem[g],
                       preferred_element_type=jnp.float32)    # (N, 128)
        h = part if h is None else h + part
    h = jnp.maximum(h * s3_ref[...] + b3_ref[...], 0.0)       # (N, 128)

    # --- Dropout(p=0.1) is the identity in eval mode; fc2.
    out_ref[...] = (jnp.dot(h, wfc2_ref[...], preferred_element_type=jnp.float32)
                    + bfc2_ref[...])


# ----------------------------------------------------------------------------
# Wrapper
# ----------------------------------------------------------------------------
def _build_tap_masks(N, H, W, KH, KW):
    """(KH*KW, N*H*W) 0/1 validity masks for the zero-padding halo."""
    q = jnp.arange(N * H * W, dtype=jnp.int32)
    jj = q % W
    ii = (q // W) % H
    masks = []
    for ki in range(KH):
        for kj in range(KW):
            di = ki - (KH - 1) // 2
            dj = kj - (KW - 1) // 2
            valid = ((ii + di >= 0) & (ii + di < H) &
                     (jj + dj >= 0) & (jj + dj < W))
            masks.append(valid)
    return jnp.stack(masks, axis=0).astype(jnp.float32)


def cnn2d_forward(x_nchw, params):
    """Forward pass matching CNN_2d.forward (eval mode)."""
    N, Cin, H, W = x_nchw.shape
    # Only input prep left in XLA: NCHW -> (Cin, N*H*W) (tiny, fused by XLA).
    x_cm = jnp.transpose(x_nchw, (1, 0, 2, 3)).reshape(Cin, N * H * W)

    KH, C2, _ = params["conv2_w"].shape
    KW = KH
    C2G = params["fc1_w"].shape[0]
    G = C2 // C2G
    O2 = params["fc2_w"].shape[1]

    masks = _build_tap_masks(N, H, W, KH, KW)

    operands = (x_cm, masks,
                params["conv1_w"], params["conv1_scale"], params["conv1_shift"],
                params["conv2_w"], params["conv2_scale"], params["conv2_shift"],
                params["fc1_w"], params["fc1_scale"], params["fc1_shift"],
                params["fc2_w"], params["fc2_b"])

    def full_spec(a):
        nd = a.ndim
        return pl.BlockSpec(a.shape, lambda i, _nd=nd: (0,) * _nd)

    in_specs = [full_spec(a) for a in operands]
    in_specs[8] = pl.BlockSpec(memory_space=pl.ANY)   # fc1_w stays in HBM

    kernel = functools.partial(_cnn2d_fused_kernel, N=N, H=H, W=W,
                               KH=KH, KW=KW, CH_GROUP=G)
    return pl.pallas_call(
        kernel,
        out_shape=jax.ShapeDtypeStruct((N, O2), jnp.float32),
        grid=(1,),
        in_specs=in_specs,
        out_specs=pl.BlockSpec((N, O2), lambda i: (0, 0)),
        scratch_shapes=[
            pltpu.VMEM(params["fc1_w"].shape, params["fc1_w"].dtype),
            pltpu.SemaphoreType.DMA,
        ],
        compiler_params=pltpu.CompilerParams(
            dimension_semantics=("arbitrary",)),
    )(*operands)


# ----------------------------------------------------------------------------
# Deterministic parameter initialization (shapes from CNN_2d.__init__),
# pre-transformed once into kernel-friendly layouts.
# ----------------------------------------------------------------------------
def init_params(key, input_dim, output_dim, num_fc1=100, kernel_size=3,
                eps=1e-5, channel_group=4):
    Hin, Win = input_dim
    init_f = 8
    Cin = 1
    c2 = 2 * init_f
    HW = Hin * Win
    num_flatten = HW * c2
    F = ((num_fc1 + 127) // 128) * 128          # lane-dense fc1 width (100 -> 128)
    G = channel_group
    assert c2 % G == 0
    ks = jax.random.split(key, 20)

    def bn_fold(gamma, beta, mean, var, bias):
        # y = gamma * (z + bias - mean) / sqrt(var + eps) + beta = z*s + shift
        s = gamma / jnp.sqrt(var + eps)
        shift = bias * s + beta - mean * s
        return s, shift

    def bn_params(k0, k1, k2, k3, c):
        gamma = 1.0 + 0.1 * jax.random.normal(k0, (c,), jnp.float32)
        beta = 0.1 * jax.random.normal(k1, (c,), jnp.float32)
        mean = 0.1 * jax.random.normal(k2, (c,), jnp.float32)
        var = 1.0 + 0.1 * jnp.abs(jax.random.normal(k3, (c,), jnp.float32))
        return gamma, beta, mean, var

    # conv1: Conv2d(1, 8, k=3, pad=1) + BatchNorm2d(8), folded.
    # HWIO -> (C1, KH*KW*Cin), columns (ki*KW + kj)*Cin + ci (tap-major).
    w1 = 0.1 * jax.random.normal(ks[0], (kernel_size, kernel_size, Cin, init_f),
                                 jnp.float32)
    conv1_w = jnp.transpose(w1, (3, 0, 1, 2)).reshape(
        init_f, kernel_size * kernel_size * Cin)
    conv1_b = 0.05 * jax.random.normal(ks[1], (init_f,), jnp.float32)
    s1, sh1 = bn_fold(*bn_params(ks[2], ks[3], ks[4], ks[5], init_f), conv1_b)

    # conv2: Conv2d(8, 16, k=3, pad=1) + BatchNorm2d(16), folded.
    # HWIO -> (KH, C2, KW*C1): one dense slab per kernel row (tap group).
    w2 = 0.1 * jax.random.normal(ks[6], (kernel_size, kernel_size, init_f, c2),
                                 jnp.float32)
    conv2_w = jnp.transpose(w2, (0, 3, 1, 2)).reshape(
        kernel_size, c2, kernel_size * init_f)
    conv2_b = 0.05 * jax.random.normal(ks[7], (c2,), jnp.float32)
    s2, sh2 = bn_fold(*bn_params(ks[8], ks[9], ks[10], ks[11], c2), conv2_b)

    # fc1: Linear(num_flatten, num_fc1) + BatchNorm1d(num_fc1), folded.
    # Logical (num_flatten, num_fc1) with rows f = c*H*W + p (PyTorch flatten
    # order); zero-padded to 128 lanes, reshaped into per-channel-group slabs
    # (C2/G, G*HW, 128), stored bf16 (halves the dominant HBM stream).
    fc1_w = 0.02 * jax.random.normal(ks[12], (num_flatten, num_fc1), jnp.float32)
    fc1_b = 0.05 * jax.random.normal(ks[13], (num_fc1,), jnp.float32)
    s3, sh3 = bn_fold(*bn_params(ks[14], ks[15], ks[16], ks[17], num_fc1), fc1_b)
    fc1_w_p = jnp.zeros((num_flatten, F), jnp.float32).at[:, :num_fc1].set(fc1_w)
    fc1_w_p = fc1_w_p.reshape(c2 // G, G * HW, F).astype(jnp.bfloat16)
    s3_p = jnp.zeros((F,), jnp.float32).at[:num_fc1].set(s3)
    sh3_p = jnp.zeros((F,), jnp.float32).at[:num_fc1].set(sh3)

    # fc2: Linear(num_fc1, output_dim); padded contraction rows are zero.
    fc2_w = 0.1 * jax.random.normal(ks[18], (num_fc1, output_dim), jnp.float32)
    fc2_w_p = jnp.zeros((F, output_dim), jnp.float32).at[:num_fc1, :].set(fc2_w)
    fc2_b = 0.05 * jax.random.normal(ks[19], (1, output_dim), jnp.float32)

    return {
        "conv1_w": conv1_w,
        "conv1_scale": s1.reshape(init_f, 1), "conv1_shift": sh1.reshape(init_f, 1),
        "conv2_w": conv2_w,
        "conv2_scale": s2.reshape(c2, 1), "conv2_shift": sh2.reshape(c2, 1),
        "fc1_w": fc1_w_p,
        "fc1_scale": s3_p.reshape(1, F), "fc1_shift": sh3_p.reshape(1, F),
        "fc2_w": fc2_w_p, "fc2_b": fc2_b,
    }


if __name__ == "__main__":
    input_dim = (16, 16)   # Hin, Win
    output_dim = 10
    batch = 2

    key = jax.random.PRNGKey(0)
    k_x, k_p = jax.random.split(key)
    x = jax.random.normal(k_x, (batch, 1, input_dim[0], input_dim[1]),
                          jnp.float32)  # NCHW, Cin fixed to 1 by the module
    params = init_params(k_p, input_dim, output_dim)

    out = jax.jit(cnn2d_forward)(x, params)
    out = jax.block_until_ready(out)
    assert out.shape == (batch, output_dim), out.shape
    assert bool(jnp.all(jnp.isfinite(out)))
    print("KERNEL_OK")
</pallas_src>

<mosaic_0001>
module attributes {stable_mosaic.version = 11 : i64} {
  func.func @_cnn2d_fused_kernel(%arg0: i32, %arg1: memref<1x512xf32, #tpu.memory_space<vmem>>, %arg2: memref<9x512xf32, #tpu.memory_space<vmem>>, %arg3: memref<8x9xf32, #tpu.memory_space<vmem>>, %arg4: memref<8x1xf32, #tpu.memory_space<vmem>>, %arg5: memref<8x1xf32, #tpu.memory_space<vmem>>, %arg6: memref<3x16x24xf32, #tpu.memory_space<vmem>>, %arg7: memref<16x1xf32, #tpu.memory_space<vmem>>, %arg8: memref<16x1xf32, #tpu.memory_space<vmem>>, %arg9: memref<4x1024x128xbf16, #tpu.memory_space<any>>, %arg10: memref<1x128xf32, #tpu.memory_space<vmem>>, %arg11: memref<1x128xf32, #tpu.memory_space<vmem>>, %arg12: memref<128x10xf32, #tpu.memory_space<vmem>>, %arg13: memref<1x10xf32, #tpu.memory_space<vmem>>, %arg14: memref<2x10xf32, #tpu.memory_space<vmem>>, %arg15: memref<4x1024x128xbf16, #tpu.memory_space<vmem>>, %arg16: memref<!tpu.dma_semaphore, #tpu.memory_space<semaphore_mem>>) attributes {dimension_semantics = [#tpu.dimension_semantics<arbitrary>], iteration_bounds = array<i64: 1>, scalar_prefetch = 0 : i64, scratch_operands = 2 : i64, tpu.core_type = #tpu.core_type<tc>, window_params = [{pipeline_mode = #tpu.pipeline_mode<synchronous>, transform_indices = @transform_0, window_bounds = array<i64: 1, 512>}, {pipeline_mode = #tpu.pipeline_mode<synchronous>, transform_indices = @transform_1, window_bounds = array<i64: 9, 512>}, {pipeline_mode = #tpu.pipeline_mode<synchronous>, transform_indices = @transform_2, window_bounds = array<i64: 8, 9>}, {pipeline_mode = #tpu.pipeline_mode<synchronous>, transform_indices = @transform_3, window_bounds = array<i64: 8, 1>}, {pipeline_mode = #tpu.pipeline_mode<synchronous>, transform_indices = @transform_4, window_bounds = array<i64: 8, 1>}, {pipeline_mode = #tpu.pipeline_mode<synchronous>, transform_indices = @transform_5, window_bounds = array<i64: 3, 16, 24>}, {pipeline_mode = #tpu.pipeline_mode<synchronous>, transform_indices = @transform_6, window_bounds = array<i64: 16, 1>}, {pipeline_mode = #tpu.pipeline_mode<synchronous>, transform_indices = @transform_7, window_bounds = array<i64: 16, 1>}, {}, {pipeline_mode = #tpu.pipeline_mode<synchronous>, transform_indices = @transform_9, window_bounds = array<i64: 1, 128>}, {pipeline_mode = #tpu.pipeline_mode<synchronous>, transform_indices = @transform_10, window_bounds = array<i64: 1, 128>}, {pipeline_mode = #tpu.pipeline_mode<synchronous>, transform_indices = @transform_11, window_bounds = array<i64: 128, 10>}, {pipeline_mode = #tpu.pipeline_mode<synchronous>, transform_indices = @transform_12, window_bounds = array<i64: 1, 10>}, {pipeline_mode = #tpu.pipeline_mode<synchronous>, transform_indices = @transform_13, window_bounds = array<i64: 2, 10>}]} {
    tpu.enqueue_dma source(%arg9 : memref<4x1024x128xbf16, #tpu.memory_space<any>>) target(%arg15 : memref<4x1024x128xbf16, #tpu.memory_space<vmem>>) target_semaphore(%arg16 : memref<!tpu.dma_semaphore, #tpu.memory_space<semaphore_mem>>)
    %c0 = arith.constant 0 : index
    %c0_0 = arith.constant 0 : index
    %0 = vector.load %arg2[%c0, %c0_0] : memref<9x512xf32, #tpu.memory_space<vmem>>, vector<9x512xf32>
    %c0_1 = arith.constant 0 : index
    %c0_2 = arith.constant 0 : index
    %1 = vector.load %arg1[%c0_1, %c0_2] : memref<1x512xf32, #tpu.memory_space<vmem>>, vector<1x512xf32>
    %c17_i32 = arith.constant 17 : i32
    %2 = tpu.dynamic_rotate %1 by %c17_i32 dim 1 : vector<1x512xf32>, i32 -> vector<1x512xf32>
    %3 = vector.extract_strided_slice %0 {offsets = [0, 0], sizes = [1, 512], strides = [1, 1]} : vector<9x512xf32> to vector<1x512xf32>
    %4 = arith.mulf %2, %3 : vector<1x512xf32>
    %c16_i32 = arith.constant 16 : i32
    %5 = tpu.dynamic_rotate %1 by %c16_i32 dim 1 : vector<1x512xf32>, i32 -> vector<1x512xf32>
    %6 = vector.extract_strided_slice %0 {offsets = [1, 0], sizes = [1, 512], strides = [1, 1]} : vector<9x512xf32> to vector<1x512xf32>
    %7 = arith.mulf %5, %6 : vector<1x512xf32>
    %c15_i32 = arith.constant 15 : i32
    %8 = tpu.dynamic_rotate %1 by %c15_i32 dim 1 : vector<1x512xf32>, i32 -> vector<1x512xf32>
    %9 = vector.extract_strided_slice %0 {offsets = [2, 0], sizes = [1, 512], strides = [1, 1]} : vector<9x512xf32> to vector<1x512xf32>
    %10 = arith.mulf %8, %9 : vector<1x512xf32>
    %c1_i32 = arith.constant 1 : i32
    %11 = tpu.dynamic_rotate %1 by %c1_i32 dim 1 : vector<1x512xf32>, i32 -> vector<1x512xf32>
    %12 = vector.extract_strided_slice %0 {offsets = [3, 0], sizes = [1, 512], strides = [1, 1]} : vector<9x512xf32> to vector<1x512xf32>
    %13 = arith.mulf %11, %12 : vector<1x512xf32>
    %14 = vector.extract_strided_slice %0 {offsets = [4, 0], sizes = [1, 512], strides = [1, 1]} : vector<9x512xf32> to vector<1x512xf32>
    %15 = arith.mulf %1, %14 : vector<1x512xf32>
    %c511_i32 = arith.constant 511 : i32
    %16 = tpu.dynamic_rotate %1 by %c511_i32 dim 1 : vector<1x512xf32>, i32 -> vector<1x512xf32>
    %17 = vector.extract_strided_slice %0 {offsets = [5, 0], sizes = [1, 512], strides = [1, 1]} : vector<9x512xf32> to vector<1x512xf32>
    %18 = arith.mulf %16, %17 : vector<1x512xf32>
    %c497_i32 = arith.constant 497 : i32
    %19 = tpu.dynamic_rotate %1 by %c497_i32 dim 1 : vector<1x512xf32>, i32 -> vector<1x512xf32>
    %20 = vector.extract_strided_slice %0 {offsets = [6, 0], sizes = [1, 512], strides = [1, 1]} : vector<9x512xf32> to vector<1x512xf32>
    %21 = arith.mulf %19, %20 : vector<1x512xf32>
    %c496_i32 = arith.constant 496 : i32
    %22 = tpu.dynamic_rotate %1 by %c496_i32 dim 1 : vector<1x512xf32>, i32 -> vector<1x512xf32>
    %23 = vector.extract_strided_slice %0 {offsets = [7, 0], sizes = [1, 512], strides = [1, 1]} : vector<9x512xf32> to vector<1x512xf32>
    %24 = arith.mulf %22, %23 : vector<1x512xf32>
    %c495_i32 = arith.constant 495 : i32
    %25 = tpu.dynamic_rotate %1 by %c495_i32 dim 1 : vector<1x512xf32>, i32 -> vector<1x512xf32>
    %26 = vector.extract_strided_slice %0 {offsets = [8, 0], sizes = [1, 512], strides = [1, 1]} : vector<9x512xf32> to vector<1x512xf32>
    %27 = arith.mulf %25, %26 : vector<1x512xf32>
    %28 = tpu.concatenate %4, %7, %10, %13, %15, %18, %21, %24, %27 in 0 : vector<1x512xf32>, vector<1x512xf32>, vector<1x512xf32>, vector<1x512xf32>, vector<1x512xf32>, vector<1x512xf32>, vector<1x512xf32>, vector<1x512xf32>, vector<1x512xf32> -> vector<9x512xf32>
    %c0_3 = arith.constant 0 : index
    %c0_4 = arith.constant 0 : index
    %29 = vector.load %arg3[%c0_3, %c0_4] : memref<8x9xf32, #tpu.memory_space<vmem>>, vector<8x9xf32>
    %cst = arith.constant dense<0.000000e+00> : vector<8x512xf32>
    %30 = tpu.matmul %29, %28, %cst {dimension_numbers = #tpu.dot_dimension_numbers<[1], [0], [0], [1], [0, 0, 1, 1], [], []>} : vector<8x9xf32>, vector<9x512xf32>, vector<8x512xf32> -> vector<8x512xf32>
    %c0_5 = arith.constant 0 : index
    %c0_6 = arith.constant 0 : index
    %31 = vector.load %arg4[%c0_5, %c0_6] : memref<8x1xf32, #tpu.memory_space<vmem>>, vector<8x1xf32>
    %32 = vector.broadcast %31 : vector<8x1xf32> to vector<8x512xf32>
    %33 = arith.mulf %30, %32 : vector<8x512xf32>
    %c0_7 = arith.constant 0 : index
    %c0_8 = arith.constant 0 : index
    %34 = vector.load %arg5[%c0_7, %c0_8] : memref<8x1xf32, #tpu.memory_space<vmem>>, vector<8x1xf32>
    %35 = vector.broadcast %34 : vector<8x1xf32> to vector<8x512xf32>
    %36 = arith.addf %33, %35 : vector<8x512xf32>
    %cst_9 = arith.constant 0.000000e+00 : f32
    %37 = vector.broadcast %cst_9 : f32 to vector<8x512xf32>
    %38 = arith.maximumf %36, %37 : vector<8x512xf32>
    %c17_i32_10 = arith.constant 17 : i32
    %39 = tpu.dynamic_rotate %38 by %c17_i32_10 dim 1 : vector<8x512xf32>, i32 -> vector<8x512xf32>
    %40 = vector.extract_strided_slice %0 {offsets = [0, 0], sizes = [1, 512], strides = [1, 1]} : vector<9x512xf32> to vector<1x512xf32>
    %41 = vector.broadcast %40 : vector<1x512xf32> to vector<8x512xf32>
    %42 = arith.mulf %39, %41 : vector<8x512xf32>
    %c16_i32_11 = arith.constant 16 : i32
    %43 = tpu.dynamic_rotate %38 by %c16_i32_11 dim 1 : vector<8x512xf32>, i32 -> vector<8x512xf32>
    %44 = vector.extract_strided_slice %0 {offsets = [1, 0], sizes = [1, 512], strides = [1, 1]} : vector<9x512xf32> to vector<1x512xf32>
    %45 = vector.broadcast %44 : vector<1x512xf32> to vector<8x512xf32>
    %46 = arith.mulf %43, %45 : vector<8x512xf32>
    %c15_i32_12 = arith.constant 15 : i32
    %47 = tpu.dynamic_rotate %38 by %c15_i32_12 dim 1 : vector<8x512xf32>, i32 -> vector<8x512xf32>
    %48 = vector.extract_strided_slice %0 {offsets = [2, 0], sizes = [1, 512], strides = [1, 1]} : vector<9x512xf32> to vector<1x512xf32>
    %49 = vector.broadcast %48 : vector<1x512xf32> to vector<8x512xf32>
    %50 = arith.mulf %47, %49 : vector<8x512xf32>
    %51 = tpu.concatenate %42, %46, %50 in 0 : vector<8x512xf32>, vector<8x512xf32>, vector<8x512xf32> -> vector<24x512xf32>
    %c0_13 = arith.constant 0 : index
    %c0_14 = arith.constant 0 : index
    %c0_15 = arith.constant 0 : index
    %52 = vector.load %arg6[%c0_13, %c0_14, %c0_15] : memref<3x16x24xf32, #tpu.memory_space<vmem>>, vector<1x16x24xf32>
    %53 = vector.shape_cast %52 : vector<1x16x24xf32> to vector<16x24xf32>
    %cst_16 = arith.constant dense<0.000000e+00> : vector<16x512xf32>
    %54 = tpu.matmul %53, %51, %cst_16 {dimension_numbers = #tpu.dot_dimension_numbers<[1], [0], [0], [1], [0, 0, 1, 1], [], []>} : vector<16x24xf32>, vector<24x512xf32>, vector<16x512xf32> -> vector<16x512xf32>
    %c1_i32_17 = arith.constant 1 : i32
    %55 = tpu.dynamic_rotate %38 by %c1_i32_17 dim 1 : vector<8x512xf32>, i32 -> vector<8x512xf32>
    %56 = vector.extract_strided_slice %0 {offsets = [3, 0], sizes = [1, 512], strides = [1, 1]} : vector<9x512xf32> to vector<1x512xf32>
    %57 = vector.broadcast %56 : vector<1x512xf32> to vector<8x512xf32>
    %58 = arith.mulf %55, %57 : vector<8x512xf32>
    %59 = vector.extract_strided_slice %0 {offsets = [4, 0], sizes = [1, 512], strides = [1, 1]} : vector<9x512xf32> to vector<1x512xf32>
    %60 = vector.broadcast %59 : vector<1x512xf32> to vector<8x512xf32>
    %61 = arith.mulf %38, %60 : vector<8x512xf32>
    %c511_i32_18 = arith.constant 511 : i32
    %62 = tpu.dynamic_rotate %38 by %c511_i32_18 dim 1 : vector<8x512xf32>, i32 -> vector<8x512xf32>
    %63 = vector.extract_strided_slice %0 {offsets = [5, 0], sizes = [1, 512], strides = [1, 1]} : vector<9x512xf32> to vector<1x512xf32>
    %64 = vector.broadcast %63 : vector<1x512xf32> to vector<8x512xf32>
    %65 = arith.mulf %62, %64 : vector<8x512xf32>
    %66 = tpu.concatenate %58, %61, %65 in 0 : vector<8x512xf32>, vector<8x512xf32>, vector<8x512xf32> -> vector<24x512xf32>
    %c1 = arith.constant 1 : index
    %c0_19 = arith.constant 0 : index
    %c0_20 = arith.constant 0 : index
    %67 = vector.load %arg6[%c1, %c0_19, %c0_20] : memref<3x16x24xf32, #tpu.memory_space<vmem>>, vector<1x16x24xf32>
    %68 = vector.shape_cast %67 : vector<1x16x24xf32> to vector<16x24xf32>
    %cst_21 = arith.constant dense<0.000000e+00> : vector<16x512xf32>
    %69 = tpu.matmul %68, %66, %cst_21 {dimension_numbers = #tpu.dot_dimension_numbers<[1], [0], [0], [1], [0, 0, 1, 1], [], []>} : vector<16x24xf32>, vector<24x512xf32>, vector<16x512xf32> -> vector<16x512xf32>
    %70 = arith.addf %54, %69 : vector<16x512xf32>
    %c497_i32_22 = arith.constant 497 : i32
    %71 = tpu.dynamic_rotate %38 by %c497_i32_22 dim 1 : vector<8x512xf32>, i32 -> vector<8x512xf32>
    %72 = vector.extract_strided_slice %0 {offsets = [6, 0], sizes = [1, 512], strides = [1, 1]} : vector<9x512xf32> to vector<1x512xf32>
    %73 = vector.broadcast %72 : vector<1x512xf32> to vector<8x512xf32>
    %74 = arith.mulf %71, %73 : vector<8x512xf32>
    %c496_i32_23 = arith.constant 496 : i32
    %75 = tpu.dynamic_rotate %38 by %c496_i32_23 dim 1 : vector<8x512xf32>, i32 -> vector<8x512xf32>
    %76 = vector.extract_strided_slice %0 {offsets = [7, 0], sizes = [1, 512], strides = [1, 1]} : vector<9x512xf32> to vector<1x512xf32>
    %77 = vector.broadcast %76 : vector<1x512xf32> to vector<8x512xf32>
    %78 = arith.mulf %75, %77 : vector<8x512xf32>
    %c495_i32_24 = arith.constant 495 : i32
    %79 = tpu.dynamic_rotate %38 by %c495_i32_24 dim 1 : vector<8x512xf32>, i32 -> vector<8x512xf32>
    %80 = vector.extract_strided_slice %0 {offsets = [8, 0], sizes = [1, 512], strides = [1, 1]} : vector<9x512xf32> to vector<1x512xf32>
    %81 = vector.broadcast %80 : vector<1x512xf32> to vector<8x512xf32>
    %82 = arith.mulf %79, %81 : vector<8x512xf32>
    %83 = tpu.concatenate %74, %78, %82 in 0 : vector<8x512xf32>, vector<8x512xf32>, vector<8x512xf32> -> vector<24x512xf32>
    %c2 = arith.constant 2 : index
    %c0_25 = arith.constant 0 : index
    %c0_26 = arith.constant 0 : index
    %84 = vector.load %arg6[%c2, %c0_25, %c0_26] : memref<3x16x24xf32, #tpu.memory_space<vmem>>, vector<1x16x24xf32>
    %85 = vector.shape_cast %84 : vector<1x16x24xf32> to vector<16x24xf32>
    %cst_27 = arith.constant dense<0.000000e+00> : vector<16x512xf32>
    %86 = tpu.matmul %85, %83, %cst_27 {dimension_numbers = #tpu.dot_dimension_numbers<[1], [0], [0], [1], [0, 0, 1, 1], [], []>} : vector<16x24xf32>, vector<24x512xf32>, vector<16x512xf32> -> vector<16x512xf32>
    %87 = arith.addf %70, %86 : vector<16x512xf32>
    %c0_28 = arith.constant 0 : index
    %c0_29 = arith.constant 0 : index
    %88 = vector.load %arg7[%c0_28, %c0_29] : memref<16x1xf32, #tpu.memory_space<vmem>>, vector<16x1xf32>
    %89 = vector.broadcast %88 : vector<16x1xf32> to vector<16x512xf32>
    %90 = arith.mulf %87, %89 : vector<16x512xf32>
    %c0_30 = arith.constant 0 : index
    %c0_31 = arith.constant 0 : index
    %91 = vector.load %arg8[%c0_30, %c0_31] : memref<16x1xf32, #tpu.memory_space<vmem>>, vector<16x1xf32>
    %92 = vector.broadcast %91 : vector<16x1xf32> to vector<16x512xf32>
    %93 = arith.addf %90, %92 : vector<16x512xf32>
    %cst_32 = arith.constant 0.000000e+00 : f32
    %94 = vector.broadcast %cst_32 : f32 to vector<16x512xf32>
    %95 = arith.maximumf %93, %94 : vector<16x512xf32>
    tpu.wait_dma2 semaphore(%arg16 : memref<!tpu.dma_semaphore, #tpu.memory_space<semaphore_mem>>) src(%arg9 : memref<4x1024x128xbf16, #tpu.memory_space<any>>) dst(%arg15 : memref<4x1024x128xbf16, #tpu.memory_space<vmem>>)
    %96 = vector.extract_strided_slice %95 {offsets = [0, 0], sizes = [1, 256], strides = [1, 1]} : vector<16x512xf32> to vector<1x256xf32>
    %97 = vector.extract_strided_slice %95 {offsets = [1, 0], sizes = [1, 256], strides = [1, 1]} : vector<16x512xf32> to vector<1x256xf32>
    %98 = vector.extract_strided_slice %95 {offsets = [2, 0], sizes = [1, 256], strides = [1, 1]} : vector<16x512xf32> to vector<1x256xf32>
    %99 = vector.extract_strided_slice %95 {offsets = [3, 0], sizes = [1, 256], strides = [1, 1]} : vector<16x512xf32> to vector<1x256xf32>
    %100 = tpu.concatenate %96, %97, %98, %99 in 1 : vector<1x256xf32>, vector<1x256xf32>, vector<1x256xf32>, vector<1x256xf32> -> vector<1x1024xf32>
    %101 = vector.extract_strided_slice %95 {offsets = [0, 256], sizes = [1, 256], strides = [1, 1]} : vector<16x512xf32> to vector<1x256xf32>
    %102 = vector.extract_strided_slice %95 {offsets = [1, 256], sizes = [1, 256], strides = [1, 1]} : vector<16x512xf32> to vector<1x256xf32>
    %103 = vector.extract_strided_slice %95 {offsets = [2, 256], sizes = [1, 256], strides = [1, 1]} : vector<16x512xf32> to vector<1x256xf32>
    %104 = vector.extract_strided_slice %95 {offsets = [3, 256], sizes = [1, 256], strides = [1, 1]} : vector<16x512xf32> to vector<1x256xf32>
    %105 = tpu.concatenate %101, %102, %103, %104 in 1 : vector<1x256xf32>, vector<1x256xf32>, vector<1x256xf32>, vector<1x256xf32> -> vector<1x1024xf32>
    %106 = tpu.concatenate %100, %105 in 0 : vector<1x1024xf32>, vector<1x1024xf32> -> vector<2x1024xf32>
    %107 = arith.truncf %106 : vector<2x1024xf32> to vector<2x1024xbf16>
    %c0_33 = arith.constant 0 : index
    %c0_34 = arith.constant 0 : index
    %c0_35 = arith.constant 0 : index
    %108 = vector.load %arg15[%c0_33, %c0_34, %c0_35] : memref<4x1024x128xbf16, #tpu.memory_space<vmem>>, vector<1x1024x128xbf16>
    %109 = vector.shape_cast %108 : vector<1x1024x128xbf16> to vector<1024x128xbf16>
    %cst_36 = arith.constant dense<0.000000e+00> : vector<2x128xf32>
    %110 = tpu.matmul %107, %109, %cst_36 {dimension_numbers = #tpu.dot_dimension_numbers<[1], [0], [0], [1], [0, 0, 1, 1], [], []>} : vector<2x1024xbf16>, vector<1024x128xbf16>, vector<2x128xf32> -> vector<2x128xf32>
    %111 = vector.extract_strided_slice %95 {offsets = [4, 0], sizes = [1, 256], strides = [1, 1]} : vector<16x512xf32> to vector<1x256xf32>
    %112 = vector.extract_strided_slice %95 {offsets = [5, 0], sizes = [1, 256], strides = [1, 1]} : vector<16x512xf32> to vector<1x256xf32>
    %113 = vector.extract_strided_slice %95 {offsets = [6, 0], sizes = [1, 256], strides = [1, 1]} : vector<16x512xf32> to vector<1x256xf32>
    %114 = vector.extract_strided_slice %95 {offsets = [7, 0], sizes = [1, 256], strides = [1, 1]} : vector<16x512xf32> to vector<1x256xf32>
    %115 = tpu.concatenate %111, %112, %113, %114 in 1 : vector<1x256xf32>, vector<1x256xf32>, vector<1x256xf32>, vector<1x256xf32> -> vector<1x1024xf32>
    %116 = vector.extract_strided_slice %95 {offsets = [4, 256], sizes = [1, 256], strides = [1, 1]} : vector<16x512xf32> to vector<1x256xf32>
    %117 = vector.extract_strided_slice %95 {offsets = [5, 256], sizes = [1, 256], strides = [1, 1]} : vector<16x512xf32> to vector<1x256xf32>
    %118 = vector.extract_strided_slice %95 {offsets = [6, 256], sizes = [1, 256], strides = [1, 1]} : vector<16x512xf32> to vector<1x256xf32>
    %119 = vector.extract_strided_slice %95 {offsets = [7, 256], sizes = [1, 256], strides = [1, 1]} : vector<16x512xf32> to vector<1x256xf32>
    %120 = tpu.concatenate %116, %117, %118, %119 in 1 : vector<1x256xf32>, vector<1x256xf32>, vector<1x256xf32>, vector<1x256xf32> -> vector<1x1024xf32>
    %121 = tpu.concatenate %115, %120 in 0 : vector<1x1024xf32>, vector<1x1024xf32> -> vector<2x1024xf32>
    %122 = arith.truncf %121 : vector<2x1024xf32> to vector<2x1024xbf16>
    %c1_37 = arith.constant 1 : index
    %c0_38 = arith.constant 0 : index
    %c0_39 = arith.constant 0 : index
    %123 = vector.load %arg15[%c1_37, %c0_38, %c0_39] : memref<4x1024x128xbf16, #tpu.memory_space<vmem>>, vector<1x1024x128xbf16>
    %124 = vector.shape_cast %123 : vector<1x1024x128xbf16> to vector<1024x128xbf16>
    %cst_40 = arith.constant dense<0.000000e+00> : vector<2x128xf32>
    %125 = tpu.matmul %122, %124, %cst_40 {dimension_numbers = #tpu.dot_dimension_numbers<[1], [0], [0], [1], [0, 0, 1, 1], [], []>} : vector<2x1024xbf16>, vector<1024x128xbf16>, vector<2x128xf32> -> vector<2x128xf32>
    %126 = arith.addf %110, %125 : vector<2x128xf32>
    %127 = vector.extract_strided_slice %95 {offsets = [8, 0], sizes = [1, 256], strides = [1, 1]} : vector<16x512xf32> to vector<1x256xf32>
    %128 = vector.extract_strided_slice %95 {offsets = [9, 0], sizes = [1, 256], strides = [1, 1]} : vector<16x512xf32> to vector<1x256xf32>
    %129 = vector.extract_strided_slice %95 {offsets = [10, 0], sizes = [1, 256], strides = [1, 1]} : vector<16x512xf32> to vector<1x256xf32>
    %130 = vector.extract_strided_slice %95 {offsets = [11, 0], sizes = [1, 256], strides = [1, 1]} : vector<16x512xf32> to vector<1x256xf32>
    %131 = tpu.concatenate %127, %128, %129, %130 in 1 : vector<1x256xf32>, vector<1x256xf32>, vector<1x256xf32>, vector<1x256xf32> -> vector<1x1024xf32>
    %132 = vector.extract_strided_slice %95 {offsets = [8, 256], sizes = [1, 256], strides = [1, 1]} : vector<16x512xf32> to vector<1x256xf32>
    %133 = vector.extract_strided_slice %95 {offsets = [9, 256], sizes = [1, 256], strides = [1, 1]} : vector<16x512xf32> to vector<1x256xf32>
    %134 = vector.extract_strided_slice %95 {offsets = [10, 256], sizes = [1, 256], strides = [1, 1]} : vector<16x512xf32> to vector<1x256xf32>
    %135 = vector.extract_strided_slice %95 {offsets = [11, 256], sizes = [1, 256], strides = [1, 1]} : vector<16x512xf32> to vector<1x256xf32>
    %136 = tpu.concatenate %132, %133, %134, %135 in 1 : vector<1x256xf32>, vector<1x256xf32>, vector<1x256xf32>, vector<1x256xf32> -> vector<1x1024xf32>
    %137 = tpu.concatenate %131, %136 in 0 : vector<1x1024xf32>, vector<1x1024xf32> -> vector<2x1024xf32>
    %138 = arith.truncf %137 : vector<2x1024xf32> to vector<2x1024xbf16>
    %c2_41 = arith.constant 2 : index
    %c0_42 = arith.constant 0 : index
    %c0_43 = arith.constant 0 : index
    %139 = vector.load %arg15[%c2_41, %c0_42, %c0_43] : memref<4x1024x128xbf16, #tpu.memory_space<vmem>>, vector<1x1024x128xbf16>
    %140 = vector.shape_cast %139 : vector<1x1024x128xbf16> to vector<1024x128xbf16>
    %cst_44 = arith.constant dense<0.000000e+00> : vector<2x128xf32>
    %141 = tpu.matmul %138, %140, %cst_44 {dimension_numbers = #tpu.dot_dimension_numbers<[1], [0], [0], [1], [0, 0, 1, 1], [], []>} : vector<2x1024xbf16>, vector<1024x128xbf16>, vector<2x128xf32> -> vector<2x128xf32>
    %142 = arith.addf %126, %141 : vector<2x128xf32>
    %143 = vector.extract_strided_slice %95 {offsets = [12, 0], sizes = [1, 256], strides = [1, 1]} : vector<16x512xf32> to vector<1x256xf32>
    %144 = vector.extract_strided_slice %95 {offsets = [13, 0], sizes = [1, 256], strides = [1, 1]} : vector<16x512xf32> to vector<1x256xf32>
    %145 = vector.extract_strided_slice %95 {offsets = [14, 0], sizes = [1, 256], strides = [1, 1]} : vector<16x512xf32> to vector<1x256xf32>
    %146 = vector.extract_strided_slice %95 {offsets = [15, 0], sizes = [1, 256], strides = [1, 1]} : vector<16x512xf32> to vector<1x256xf32>
    %147 = tpu.concatenate %143, %144, %145, %146 in 1 : vector<1x256xf32>, vector<1x256xf32>, vector<1x256xf32>, vector<1x256xf32> -> vector<1x1024xf32>
    %148 = vector.extract_strided_slice %95 {offsets = [12, 256], sizes = [1, 256], strides = [1, 1]} : vector<16x512xf32> to vector<1x256xf32>
    %149 = vector.extract_strided_slice %95 {offsets = [13, 256], sizes = [1, 256], strides = [1, 1]} : vector<16x512xf32> to vector<1x256xf32>
    %150 = vector.extract_strided_slice %95 {offsets = [14, 256], sizes = [1, 256], strides = [1, 1]} : vector<16x512xf32> to vector<1x256xf32>
    %151 = vector.extract_strided_slice %95 {offsets = [15, 256], sizes = [1, 256], strides = [1, 1]} : vector<16x512xf32> to vector<1x256xf32>
    %152 = tpu.concatenate %148, %149, %150, %151 in 1 : vector<1x256xf32>, vector<1x256xf32>, vector<1x256xf32>, vector<1x256xf32> -> vector<1x1024xf32>
    %153 = tpu.concatenate %147, %152 in 0 : vector<1x1024xf32>, vector<1x1024xf32> -> vector<2x1024xf32>
    %154 = arith.truncf %153 : vector<2x1024xf32> to vector<2x1024xbf16>
    %c3 = arith.constant 3 : index
    %c0_45 = arith.constant 0 : index
    %c0_46 = arith.constant 0 : index
    %155 = vector.load %arg15[%c3, %c0_45, %c0_46] : memref<4x1024x128xbf16, #tpu.memory_space<vmem>>, vector<1x1024x128xbf16>
    %156 = vector.shape_cast %155 : vector<1x1024x128xbf16> to vector<1024x128xbf16>
    %cst_47 = arith.constant dense<0.000000e+00> : vector<2x128xf32>
    %157 = tpu.matmul %154, %156, %cst_47 {dimension_numbers = #tpu.dot_dimension_numbers<[1], [0], [0], [1], [0, 0, 1, 1], [], []>} : vector<2x1024xbf16>, vector<1024x128xbf16>, vector<2x128xf32> -> vector<2x128xf32>
    %158 = arith.addf %142, %157 : vector<2x128xf32>
    %c0_48 = arith.constant 0 : index
    %c0_49 = arith.constant 0 : index
    %159 = vector.load %arg10[%c0_48, %c0_49] : memref<1x128xf32, #tpu.memory_space<vmem>>, vector<1x128xf32>
    %160 = vector.broadcast %159 : vector<1x128xf32> to vector<2x128xf32>
    %161 = arith.mulf %158, %160 : vector<2x128xf32>
    %c0_50 = arith.constant 0 : index
    %c0_51 = arith.constant 0 : index
    %162 = vector.load %arg11[%c0_50, %c0_51] : memref<1x128xf32, #tpu.memory_space<vmem>>, vector<1x128xf32>
    %163 = vector.broadcast %162 : vector<1x128xf32> to vector<2x128xf32>
    %164 = arith.addf %161, %163 : vector<2x128xf32>
    %cst_52 = arith.constant 0.000000e+00 : f32
    %165 = vector.broadcast %cst_52 : f32 to vector<2x128xf32>
    %166 = arith.maximumf %164, %165 : vector<2x128xf32>
    %c0_53 = arith.constant 0 : index
    %c0_54 = arith.constant 0 : index
    %167 = vector.load %arg12[%c0_53, %c0_54] : memref<128x10xf32, #tpu.memory_space<vmem>>, vector<128x10xf32>
    %cst_55 = arith.constant dense<0.000000e+00> : vector<2x10xf32>
    %168 = tpu.matmul %166, %167, %cst_55 {dimension_numbers = #tpu.dot_dimension_numbers<[1], [0], [0], [1], [0, 0, 1, 1], [], []>} : vector<2x128xf32>, vector<128x10xf32>, vector<2x10xf32> -> vector<2x10xf32>
    %c0_56 = arith.constant 0 : index
    %c0_57 = arith.constant 0 : index
    %169 = vector.load %arg13[%c0_56, %c0_57] : memref<1x10xf32, #tpu.memory_space<vmem>>, vector<1x10xf32>
    %170 = vector.broadcast %169 : vector<1x10xf32> to vector<2x10xf32>
    %171 = arith.addf %168, %170 : vector<2x10xf32>
    %c0_58 = arith.constant 0 : index
    %c0_59 = arith.constant 0 : index
    %172 = vector.load %arg14[%c0_58, %c0_59] : memref<2x10xf32, #tpu.memory_space<vmem>>, vector<2x10xf32>
    tpu.vector_store %arg14[%c0_58, %c0_59], %171 {strides = array<i32>} : memref<2x10xf32, #tpu.memory_space<vmem>>, vector<2x10xf32>,
    return
  }
  func.func @transform_0(%arg0: i32) -> (i32, i32) {
    %c0_i32 = arith.constant 0 : i32
    %c0_i32_0 = arith.constant 0 : i32
    %c0_i32_1 = arith.constant 0 : i32
    return %c0_i32, %c0_i32_0 : i32, i32
  }
  func.func @transform_1(%arg0: i32) -> (i32, i32) {
    %c0_i32 = arith.constant 0 : i32
    %c0_i32_0 = arith.constant 0 : i32
    %c0_i32_1 = arith.constant 0 : i32
    return %c0_i32, %c0_i32_0 : i32, i32
  }
  func.func @transform_2(%arg0: i32) -> (i32, i32) {
    %c0_i32 = arith.constant 0 : i32
    %c0_i32_0 = arith.constant 0 : i32
    %c0_i32_1 = arith.constant 0 : i32
    return %c0_i32, %c0_i32_0 : i32, i32
  }
  func.func @transform_3(%arg0: i32) -> (i32, i32) {
    %c0_i32 = arith.constant 0 : i32
    %c0_i32_0 = arith.constant 0 : i32
    %c0_i32_1 = arith.constant 0 : i32
    return %c0_i32, %c0_i32_0 : i32, i32
  }
  func.func @transform_4(%arg0: i32) -> (i32, i32) {
    %c0_i32 = arith.constant 0 : i32
    %c0_i32_0 = arith.constant 0 : i32
    %c0_i32_1 = arith.constant 0 : i32
    return %c0_i32, %c0_i32_0 : i32, i32
  }
  func.func @transform_5(%arg0: i32) -> (i32, i32, i32) {
    %c0_i32 = arith.constant 0 : i32
    %c0_i32_0 = arith.constant 0 : i32
    %c0_i32_1 = arith.constant 0 : i32
    %c0_i32_2 = arith.constant 0 : i32
    return %c0_i32, %c0_i32_0, %c0_i32_1 : i32, i32, i32
  }
  func.func @transform_6(%arg0: i32) -> (i32, i32) {
    %c0_i32 = arith.constant 0 : i32
    %c0_i32_0 = arith.constant 0 : i32
    %c0_i32_1 = arith.constant 0 : i32
    return %c0_i32, %c0_i32_0 : i32, i32
  }
  func.func @transform_7(%arg0: i32) -> (i32, i32) {
    %c0_i32 = arith.constant 0 : i32
    %c0_i32_0 = arith.constant 0 : i32
    %c0_i32_1 = arith.constant 0 : i32
    return %c0_i32, %c0_i32_0 : i32, i32
  }
  func.func @transform_9(%arg0: i32) -> (i32, i32) {
    %c0_i32 = arith.constant 0 : i32
    %c0_i32_0 = arith.constant 0 : i32
    %c0_i32_1 = arith.constant 0 : i32
    return %c0_i32, %c0_i32_0 : i32, i32
  }
  func.func @transform_10(%arg0: i32) -> (i32, i32) {
    %c0_i32 = arith.constant 0 : i32
    %c0_i32_0 = arith.constant 0 : i32
    %c0_i32_1 = arith.constant 0 : i32
    return %c0_i32, %c0_i32_0 : i32, i32
  }
  func.func @transform_11(%arg0: i32) -> (i32, i32) {
    %c0_i32 = arith.constant 0 : i32
    %c0_i32_0 = arith.constant 0 : i32
    %c0_i32_1 = arith.constant 0 : i32
    return %c0_i32, %c0_i32_0 : i32, i32
  }
  func.func @transform_12(%arg0: i32) -> (i32, i32) {
    %c0_i32 = arith.constant 0 : i32
    %c0_i32_0 = arith.constant 0 : i32
    %c0_i32_1 = arith.constant 0 : i32
    return %c0_i32, %c0_i32_0 : i32, i32
  }
  func.func @transform_13(%arg0: i32) -> (i32, i32) {
    %c0_i32 = arith.constant 0 : i32
    %c0_i32_0 = arith.constant 0 : i32
    %c0_i32_1 = arith.constant 0 : i32
    return %c0_i32, %c0_i32_0 : i32, i32
  }
}

</mosaic_0001>

<bundles_post_ra>
// kernel: cnn2d_forward.1
= control target key start
LH: loop header
LB: loop body
LE: loop exit
PB: predicated region body
PF: predicated region fallthrough
CT: control target
= control target key end

     0   :  { %v65_v0 = vlaneseq  ;;  %s6557_s0 = inlined_call_operand.vmem [shape: f32[1,512], index: 0, kind: input, shape index: {}]   ;;  %s6558_s1 = inlined_call_operand.vmem [shape: f32[9,512], index: 1, kind: input, shape index: {}]   ;;  %s6559_s2 = inlined_call_operand.vmem [shape: f32[8,9], index: 2, kind: input, shape index: {}]   ;;  %s6560_s3 = inlined_call_operand.vmem [shape: f32[8,1], index: 3, kind: input, shape index: {}]   ;;  %s6561_s4 = inlined_call_operand.vmem [shape: f32[8,1], index: 4, kind: input, shape index: {}]   ;;  %s6562_s5 = inlined_call_operand.vmem [shape: f32[3,16,24], index: 5, kind: input, shape index: {}]   ;;  %s6563_s6 = inlined_call_operand.vmem [shape: f32[16,1], index: 6, kind: input, shape index: {}]   ;;  %s6564_s7 = inlined_call_operand.vmem [shape: f32[16,1], index: 7, kind: input, shape index: {}]   ;;  %s6565_s8 = inlined_call_operand.hbm [shape: bf16[4,1024,128], index: 8, kind: input, shape index: {}]   ;;  %s6566_s9 = inlined_call_operand.vmem [shape: f32[1,128], index: 9, kind: input, shape index: {}]   ;;  %s6567_s10 = inlined_call_operand.vmem [shape: f32[1,128], index: 10, kind: input, shape index: {}]   ;;  %s6568_s11 = inlined_call_operand.vmem [shape: f32[128,10], index: 11, kind: input, shape index: {}]   ;;  %s6569_s12 = inlined_call_operand.vmem [shape: f32[1,10], index: 12, kind: input, shape index: {}]   ;;  %s6570_s13 = inlined_call_operand.hbm [shape: f32[2,10], index: 13, kind: output, shape index: {}]  }
   0x1   :  { %v5557_v2 = vld [vmem:[%s6557_s0] sm:$0xf] }
   0x2   :  { %v5552_v1 = vshrl.u32 %v65_v0, 7 }
   0x3   :  { %18 = vsyncpa [#allocation5], 0  ;;  %s5467_s27 = smov 16   ;;  %s5468_s0 = smov 15   ;;  %v5475_v11 = vmov 0.0   ;;  %v5476_v12 = vmov 0  }
   0x4   :  { %v5560_v3 = vsub.s32 3, %v5552_v1  ;;  %v5563_v4 = vsub.s32 0, %v5552_v1  ;;  %v5566_v5 = vsub.s32 1, %v5552_v1  ;;  %s5469_s28 = smov 17   ;;  %s5470_s29 = smov 1   ;;  %v5585_v9 = vsub.s32 2, %v5552_v1  ;;  %510 = vmatprep.mubr.f32.mxu1 %v5475_v11  ;;  %1028 = vmatprep.mubr.f32.mxu0 %v5475_v11 }
   0x5   :  { %s5471_s30 = smov 127   ;;  %s5472_s14 = smov 113   ;;  %5163 = vset.pattern.permute.xlu0 %v5476_v12  ;;  %5164 = vset.pattern.permute.xlu1 %v5476_v12  ;;  %v588_v13 = vld [vmem:[%s6560_s3] sm:$0xff]  ;;  %v5477_v17 = vmov 1966171168   ;;  %v5628_v24 = vld [vmem:[%s6558_s1 + $0x10] sm:$0xff] }
   0x6   :  { %v80_v6 = vrot.slane %v5557_v2, %v5560_v3  ;;  %v68_v7 = vrot.slane %v5557_v2, %v5563_v4  ;;  %v72_v8 = vrot.slane %v5557_v2, %v5566_v5  ;;  %v76_v10 = vrot.slane %v5557_v2, %v5585_v9  ;;  %s5473_s15 = smov 112   ;;  %s5474_s16 = smov 111   ;;  %v598_v14 = vld [vmem:[%s6561_s4] sm:$0xff]  ;;  %v5633_v25 = vld [vmem:[%s6558_s1 + $0x18] sm:$0xff]  ;;  %v5643_v27 = vld [vmem:[%s6558_s1 + $0x8] sm:$0xff] }
   0x7   :  { %v186_v18 = vunpack.c.l.s4 %v5477_v17  ;;  %v5638_v26 = vld [vmem:[%s6558_s1] sm:$0xff]  ;;  %v184_v30 = vcombine.high %v5628_v24, %v5633_v25  ;;  %v5661_v41 = vand.u32 127, %v65_v0  ;;  %v122_v45 = vrot.slane %v5643_v27, 1  ;;  %s5478_s4 = smov [#allocation2]  }
   0x8   :  { %110 = vrot.lane.b32.xlu1 %v80_v6, %s5467_s27  ;;  %104 = vrot.lane.b32.xlu0 %v68_v7, %s5467_s27  ;;  %v183_v29 = vcombine.high %v5638_v26, %v5643_v27  ;;  %v121_v44 = vrot.slane %v5638_v26, 1  ;;  %v147_v47 = vrot.slane %v5643_v27, 2  ;;  %v146_v51 = vrot.slane %v5638_v26, 2  ;;  %s51_s22 = sshll.u32 %s5478_s4, 4  ;;  %s52_s22 = int_to_ptr.vmem [resolvable:$true] %s51_s22 }
   0x9   :  { %v187_v21 = vunpack.c.0.s8 %v186_v18  ;;  %vm112_vm0 = vcmp.lt.s32.totalorder %v5661_v41, 16  ;;  %vm95_vm1 = vcmp.lt.s32.totalorder %v5661_v41, 17  ;;  %vm166_vm2 = vcmp.lt.s32.totalorder %v5661_v41, 1  ;;  %s5431_s23 = scalar_lea.vmem %s52_s22, 32768  ;;  %p5436_p1 = scmp.lt.s32.totalorder %s52_s22, %s52_s22 }
   0xa   :  { %vm141_vm3 = vcmp.lt.s32.totalorder %v5661_v41, 15  ;;  %vm394_vm4 = vcmask 1040384   ;;  %vm399_vm5 = vcmask 1041408   ;;  %v172_v52 = vrot.slane %v5643_v27, 3  ;;  %p5432_p0 = scmp.ne.s32.totalorder %s52_s22, %s5431_s23  ;;  %p5437_p2 = scmp.lt.s32.totalorder %s5431_s23, %s5431_s23 }
   0xb   :  { %v190_v28 = vsub.s32 %v187_v21, %v5552_v1  ;;  %v171_v53 = vrot.slane %v5638_v26, 3  ;;  %v123_v54 = vrot.slane %v5628_v24, 1  ;;  %v124_v55 = vrot.slane %v5633_v25, 1 }
   0xc   :  { %133 = vrot.lane.b32.xlu1 %v68_v7, %s5468_s0  ;;  %106 = vrot.lane.b32.xlu0 %v72_v8, %s5467_s27  ;;  %vm404_vm6 = vcmask 1042432   ;;  %v148_v62 = vrot.slane %v5628_v24, 2  ;;  %vm217_vm7 = vcmp.lt.s32.totalorder %v5661_v41, 127  ;;  %vm409_vm8 = vcmask 1043456   ;;  %p5438_p3 = por %p5437_p2, %p5436_p1 }
   0xd   :  { %v191_v33 = vrot.slane %v183_v29, %v190_v28  ;;  %v198_v34 = vrot.slane %v184_v30, %v190_v28  ;;  %v222_v18 = vrot.slane %v5638_v26, 5  ;;  %vm242_vm9 = vcmp.lt.s32.totalorder %v5661_v41, 113 }
   0xe   :  { %v247_v30 = vrot.slane %v5638_v26, 6  ;;  %vm267_vm10 = vcmp.lt.s32.totalorder %v5661_v41, 112  ;;  %vm292_vm11 = vcmp.lt.s32.totalorder %v5661_v41, 111  ;;  %vm414_vm12 = vcmask 1044480   ;;  %v4480_v41 = vld [vmem:[%s6562_s5 + $0x28] sm:$0xff]  ;;  %p5439_p4 = pnand %p5438_p3, %p5432_p0 }
   0xf   :  { %v199_v37 = vcombine.low %v191_v33, %v198_v34  ;;  %v173_v34 = vrot.slane %v5628_v24, 3  ;;  %vm419_vm13 = vcmask 1045504   ;;  %vm424_vm14 = vcmask 1046528  }
  0x10   :  { %85 = vrot.lane.b32.xlu1 %v68_v7, %s5469_s28  ;;  %135 = vrot.lane.b32.xlu0 %v72_v8, %s5468_s0  ;;  %vm430_vm15 = vcmask 72704  }
  0x11   :  { %v206_v40 = vrot.slane %v199_v37, %v190_v28  ;;  %v174_v37 = vrot.slane %v5633_v25, 3 }
  0x13   :  { %v5670_v46 = vmul.f32 %v206_v40, %v5557_v2 }
  0x14   :  { %139 = vrot.lane.b32.xlu1 %v80_v6, %s5468_s0  ;;  %87 = vrot.lane.b32.xlu0 %v72_v8, %s5469_s28 }
  0x15   :  { %v345_v59 = vrot.slane %v5670_v46, %v5566_v5  ;;  %v341_v2 = vrot.slane %v5670_v46, %v5563_v4 }
  0x18   :  { %160 = vrot.lane.b32.xlu1 %v72_v8, %s5470_s29  ;;  %158 = vrot.lane.b32.xlu0 %v68_v7, %s5470_s29 }
  0x1c   :  { %164 = vrot.lane.b32.xlu1 %v80_v6, %s5470_s29  ;;  %91 = vrot.lane.b32.xlu0 %v80_v6, %s5469_s28 }
  0x20   :  { %211 = vrot.lane.b32.xlu1 %v72_v8, %s5471_s30  ;;  %108 = vrot.lane.b32.xlu0 %v76_v10, %s5467_s27 }
  0x24   :  { %137 = vrot.lane.b32.xlu1 %v76_v10, %s5468_s0  ;;  %213 = vrot.lane.b32.xlu0 %v76_v10, %s5471_s30 }
  0x28   :  { %236 = vrot.lane.b32.xlu1 %v72_v8, %s5472_s14  ;;  %209 = vrot.lane.b32.xlu0 %v68_v7, %s5471_s30 }
  0x2c   :  { %89 = vrot.lane.b32.xlu1 %v76_v10, %s5469_s28  ;;  %238 = vrot.lane.b32.xlu0 %v76_v10, %s5472_s14 }
  0x30   :  { %234 = vrot.lane.b32.xlu1 %v68_v7, %s5472_s14  ;;  %162 = vrot.lane.b32.xlu0 %v76_v10, %s5470_s29 }
  0x34   :  { %263 = vrot.lane.b32.xlu1 %v76_v10, %s5473_s15  ;;  %261 = vrot.lane.b32.xlu0 %v72_v8, %s5473_s15 }
  0x38   :  { %286 = vrot.lane.b32.xlu1 %v72_v8, %s5474_s16  ;;  %259 = vrot.lane.b32.xlu0 %v68_v7, %s5473_s15  ;;  %v223_v8 = vrot.slane %v5643_v27, 5 }
  0x3c   :  { %215 = vrot.lane.b32.xlu1 %v80_v6, %s5471_s30  ;;  %288 = vrot.lane.b32.xlu0 %v76_v10, %s5474_s16 }
  0x40   :  { %240 = vrot.lane.b32.xlu1 %v80_v6, %s5472_s14  ;;  %284 = vrot.lane.b32.xlu0 %v68_v7, %s5474_s16  ;;  %v149_v7 = vrot.slane %v5633_v25, 2 }
  0x44   :  { %290 = vrot.lane.b32.xlu1 %v80_v6, %s5474_s16  ;;  %265 = vrot.lane.b32.xlu0 %v80_v6, %s5473_s15 }
  0x48   :  { %591 = vperm.xlu0 %5163, %v588_v13   ;;  %601 = vperm.xlu1 %5164, %v598_v14  }
  0x7a   :  { %v5619_v15 = vpop.permute.xlu1 %110  ;;  %v105_v16 = vpop.permute.xlu0 %104 }
  0x7b   :  { %v116_v56 = vsel %vm112_vm0, %v5619_v15, %v105_v16 }
  0x7c   :  { %v129_v10 = vmul.f32 %v121_v44, %v116_v56 }
  0x7e   :  { %v134_v19 = vpop.permute.xlu1 %133  ;;  %v5621_v20 = vpop.permute.xlu0 %106 }
  0x7f   :  { %v115_v50 = vsel %vm112_vm0, %v105_v16, %v5621_v20 }
  0x80   :  { %v130_v60 = vmul.f32 %v122_v45, %v115_v50  ;;  %v273_v50 = vrot.slane %v5643_v27, 7 }
  0x82   :  { %v86_v22 = vpop.permute.xlu1 %85  ;;  %v5623_v23 = vpop.permute.xlu0 %135  ;;  %v306_v21 = vrot.slane %v130_v60, 7  ;;  %v272_v60 = vrot.slane %v5638_v26, 7 }
  0x83   :  { %v144_v61 = vsel %vm141_vm3, %v134_v19, %v5623_v23 }
  0x84   :  { %v155_v16 = vmul.f32 %v147_v47, %v144_v61  ;;  %v224_v61 = vrot.slane %v5628_v24, 5 }
  0x86   :  { %v5650_v31 = vpop.permute.xlu1 %139  ;;  %v5652_v32 = vpop.permute.xlu0 %87  ;;  %v318_v47 = vrot.slane %v155_v16, 6 }
  0x87   :  { %v98_v57 = vsel %vm95_vm1, %v86_v22, %v5652_v32  ;;  %v145_v12 = vsel %vm141_vm3, %v5650_v31, %v134_v19  ;;  %v248_v19 = vrot.slane %v5643_v27, 6 }
  0x88   :  { %v101_v13 = vmul.f32 %v98_v57, %v5643_v27  ;;  %v154_v33 = vmul.f32 %v146_v51, %v145_v12  ;;  %v353_v51 = vrot.slane %v5670_v46, %v5560_v3  ;;  %v249_v12 = vrot.slane %v5628_v24, 6 }
  0x8a   :  { %v5654_v35 = vpop.permute.xlu1 %160  ;;  %v159_v36 = vpop.permute.xlu0 %158  ;;  %v396_v40 = vsel %vm394_vm4, %v101_v13, %v306_v21  ;;  %v250_v13 = vrot.slane %v5633_v25, 6 }
  0x8b   :  { %v169_v58 = vsel %vm166_vm2, %v159_v36, %v5654_v35 }
  0x8c   :  { %v180_v14 = vmul.f32 %v172_v52, %v169_v58  ;;  %v349_v52 = vrot.slane %v5670_v46, %v5585_v9 }
  0x8e   :  { %v5656_v38 = vpop.permute.xlu1 %164  ;;  %v5658_v39 = vpop.permute.xlu0 %91  ;;  %v330_v44 = vrot.slane %v180_v14, 5 }
  0x8f   :  { %v99_v6 = vsel %vm95_vm1, %v5658_v39, %v86_v22  ;;  %v170_v17 = vsel %vm166_vm2, %v5656_v38, %v159_v36  ;;  %v305_v36 = vrot.slane %v129_v10, 7  ;;  %v401_v10 = vsel %vm399_vm5, %v396_v40, %v318_v47 }
  0x90   :  { %v100_v22 = vmul.f32 %v99_v6, %v5638_v26  ;;  %v179_v45 = vmul.f32 %v171_v53, %v170_v17  ;;  %v225_v53 = vrot.slane %v5633_v25, 5  ;;  %v317_v6 = vrot.slane %v154_v33, 6 }
  0x91   :  { %v406_v14 = vsel %vm404_vm6, %v401_v10, %v330_v44 }
  0x92   :  { %v5663_v42 = vpop.permute.xlu1 %211  ;;  %v5665_v43 = vpop.permute.xlu0 %108  ;;  %v395_v56 = vsel %vm394_vm4, %v100_v22, %v305_v36  ;;  %v329_v16 = vrot.slane %v179_v45, 5  ;;  %v275_v45 = vrot.slane %v5633_v25, 7 }
  0x93   :  { %v113_v17 = vsel %vm112_vm0, %v5665_v43, %v5619_v15  ;;  %v114_v21 = vsel %vm112_vm0, %v5621_v20, %v5665_v43  ;;  %v400_v22 = vsel %vm399_vm5, %v395_v56, %v317_v6  ;;  %v274_v15 = vrot.slane %v5628_v24, 7 }
  0x94   :  { %v131_v47 = vmul.f32 %v123_v54, %v114_v21  ;;  %v405_v54 = vsel %vm404_vm6, %v400_v22, %v329_v16 }
  0x96   :  { %v5676_v48 = vpop.permute.xlu1 %137  ;;  %v5678_v49 = vpop.permute.xlu0 %213  ;;  %v307_v16 = vrot.slane %v131_v47, 7 }
  0x97   :  { %v219_v33 = vsel %vm217_vm7, %v5663_v42, %v5678_v49  ;;  %v142_v20 = vsel %vm141_vm3, %v5676_v48, %v5650_v31  ;;  %v143_v43 = vsel %vm141_vm3, %v5623_v23, %v5676_v48  ;;  %v132_v31 = vmul.f32 %v124_v55, %v113_v17 }
  0x98   :  { %v411_v23 = vsel %vm409_vm8, %v406_v14, %v345_v59  ;;  %v156_v55 = vmul.f32 %v148_v62, %v143_v43  ;;  %v5835_v43 = vld [vmem:[%s6558_s1 + $0x28] sm:$0x1] }
  0x9a   :  { %v5704_v63 = vpop.permute.xlu1 %236  ;;  %v5706_v0 = vpop.permute.xlu0 %209 }
  0x9b   :  { %v220_v36 = vsel %vm217_vm7, %v5706_v0, %v5663_v42 }
  0x9c   :  { %v230_v48 = vmul.f32 %v222_v18, %v220_v36 }
  0x9e   :  { %v90_v28 = vpop.permute.xlu1 %89  ;;  %v5726_v29 = vpop.permute.xlu0 %238  ;;  %v362_v21 = vrot.slane %v230_v48, 3 }
  0x9f   :  { %v97_v40 = vsel %vm95_vm1, %v5652_v32, %v90_v28  ;;  %v96_v56 = vsel %vm95_vm1, %v90_v28, %v5658_v39  ;;  %v231_v32 = vmul.f32 %v223_v8, %v219_v33  ;;  %v244_v6 = vsel %vm242_vm9, %v5704_v63, %v5726_v29 }
  0xa0   :  { %v157_v39 = vmul.f32 %v149_v7, %v142_v20  ;;  %v102_v28 = vmul.f32 %v97_v40, %v5628_v24  ;;  %v103_v8 = vmul.f32 %v96_v56, %v5633_v25 }
  0xa2   :  { %v5740_v57 = vpop.permute.xlu1 %234  ;;  %v163_v58 = vpop.permute.xlu0 %162  ;;  %v320_v40 = vrot.slane %v157_v39, 6 }
  0xa3   :  { %v245_v59 = vsel %vm242_vm9, %v5740_v57, %v5704_v63  ;;  %v167_v18 = vsel %vm166_vm2, %v163_v58, %v5656_v38  ;;  %v168_v62 = vsel %vm166_vm2, %v5654_v35, %v163_v58  ;;  %v256_v63 = vmul.f32 %v248_v19, %v244_v6 }
  0xa4   :  { %v410_v38 = vsel %vm409_vm8, %v405_v54, %v341_v2  ;;  %v308_v35 = vrot.slane %v132_v31, 7  ;;  %v363_v58 = vrot.slane %v231_v32, 3  ;;  %v255_v22 = vmul.f32 %v247_v30, %v245_v59 }
  0xa5   :  { %v181_v33 = vmul.f32 %v173_v34, %v168_v62  ;;  %v182_v19 = vmul.f32 %v174_v37, %v167_v18  ;;  %v319_v2 = vrot.slane %v156_v55, 6  ;;  %v375_v34 = vrot.slane %v256_v63, 2 }
  0xa6   :  { %v5779_v44 = vpop.permute.xlu1 %263  ;;  %v262_v42 = vpop.permute.xlu0 %261  ;;  %v398_v47 = vsel %vm394_vm4, %v103_v8, %v308_v35  ;;  %v374_v56 = vrot.slane %v255_v22, 2  ;;  %v416_v48 = vsel %vm414_vm12, %v411_v23, %v363_v58  ;;  %v415_v6 = vsel %vm414_vm12, %v410_v38, %v362_v21 }
  0xa7   :  { %v269_v7 = vsel %vm267_vm10, %v262_v42, %v5779_v44  ;;  %v331_v54 = vrot.slane %v181_v33, 5  ;;  %v332_v55 = vrot.slane %v182_v19, 5  ;;  %v403_v59 = vsel %vm399_vm5, %v398_v47, %v320_v40 }
  0xa8   :  { %v281_v36 = vmul.f32 %v273_v50, %v269_v7  ;;  %v420_v35 = vsel %vm419_vm13, %v415_v6, %v374_v56 }
  0xa9   :  { %v408_v58 = vsel %vm404_vm6, %v403_v59, %v332_v55 }
  0xaa   :  { %v287_v10 = vpop.permute.xlu1 %286  ;;  %v5817_v14 = vpop.permute.xlu0 %259  ;;  %v387_v39 = vrot.slane %v281_v36, 1 }
  0xab   :  { %v270_v17 = vsel %vm267_vm10, %v5817_v14, %v262_v42  ;;  %v397_v42 = vsel %vm394_vm4, %v102_v28, %v307_v16 }
  0xac   :  { %v280_v20 = vmul.f32 %v272_v60, %v270_v17 }
  0xae   :  { %v216_v30 = vpop.permute.xlu1 %215  ;;  %v289_v31 = vpop.permute.xlu0 %288  ;;  %v386_v28 = vrot.slane %v280_v20, 1 }
  0xaf   :  { %v218_v37 = vsel %vm217_vm7, %v5678_v49, %v216_v30  ;;  %v221_v50 = vsel %vm217_vm7, %v216_v30, %v5706_v0  ;;  %v294_v60 = vsel %vm292_vm11, %v287_v10, %v289_v31  ;;  %v5853_v49 = vld [vmem:[%s6558_s1 + $0x20] sm:$0x1]  ;;  %v402_v0 = vsel %vm399_vm5, %v397_v42, %v319_v2 }
  0xb0   :  { %v298_v32 = vmul.f32 %v294_v60, %v5835_v43  ;;  %v232_v8 = vmul.f32 %v224_v61, %v218_v37  ;;  %v233_v23 = vmul.f32 %v225_v53, %v221_v50  ;;  %v421_v61 = vsel %vm419_vm13, %v416_v48, %v375_v34  ;;  %v429_v2 = vld [vmem:[%s6559_s2] sm:$0xff] }
  0xb1   :  { %vm797_vm5 = vcmask 195584  }
  0xb2   :  { %v241_v18 = vpop.permute.xlu1 %240  ;;  %v285_v62 = vpop.permute.xlu0 %284  ;;  %4463 = vmatprep.subr.msk.mxu1 %vm394_vm4, %v298_v32  ;;  %v364_v21 = vrot.slane %v232_v8, 3  ;;  %v365_v22 = vrot.slane %v233_v23, 3 }
  0xb3   :  { %v243_v7 = vsel %vm242_vm9, %v5726_v29, %v241_v18  ;;  %v246_v16 = vsel %vm242_vm9, %v241_v18, %v5740_v57  ;;  %v295_v63 = vsel %vm292_vm11, %v285_v62, %v287_v10  ;;  %v407_v29 = vsel %vm404_vm6, %v402_v0, %v331_v54  ;;  %v5882_v57 = vld [vmem:[%s6558_s1 + $0x30] sm:$0x1] }
  0xb4   :  { %v257_v53 = vmul.f32 %v249_v12, %v243_v7  ;;  %v258_v17 = vmul.f32 %v250_v13, %v246_v16  ;;  %v297_v38 = vmul.f32 %v295_v63, %v5853_v49  ;;  %v5887_v12 = vld [vmem:[%s6558_s1 + $0x38] sm:$0x1]  ;;  %v426_v13 = vsel %vm424_vm14, %v421_v61, %v387_v39 }
  0xb5   :  { %v425_v10 = vsel %vm424_vm14, %v420_v35, %v386_v28  ;;  %v1386_v35 = vld [vmem:[%s6563_s6 + $0x8] sm:$0xff] }
  0xb6   :  { %v376_v33 = vrot.slane %v257_v53, 2  ;;  %v377_v19 = vrot.slane %v258_v17, 2  ;;  %v291_v36 = vpop.permute.xlu1 %290  ;;  %v266_v20 = vpop.permute.xlu0 %265  ;;  %4464 = vmatpush1.msk.msra.mxu1 %vm394_vm4, %v297_v38  ;;  %v1385_v38 = vld [vmem:[%s6563_s6] sm:$0xff] }
  0xb7   :  { %v293_v40 = vsel %vm292_vm11, %v289_v31, %v291_v36  ;;  %v296_v42 = vsel %vm292_vm11, %v291_v36, %v285_v62  ;;  %v268_v47 = vsel %vm267_vm10, %v5779_v44, %v266_v20  ;;  %v271_v30 = vsel %vm267_vm10, %v266_v20, %v5817_v14  ;;  %476 = vmatprep.subr.mxu1 %v426_v13 }
  0xb8   :  { %v299_v34 = vmul.f32 %v293_v40, %v5882_v57  ;;  %v300_v37 = vmul.f32 %v296_v42, %v5887_v12  ;;  %v282_v50 = vmul.f32 %v274_v15, %v268_v47  ;;  %v283_v31 = vmul.f32 %v275_v45, %v271_v30  ;;  %477 = vmatpush1.msra.mxu1 %v425_v10 }
  0xb9   :  { %v412_v44 = vsel %vm409_vm8, %v407_v29, %v349_v52  ;;  %4465 = vmatmul.mubr.msk.f32.vlgmr.msra.gmra.mxu1 %vm430_vm15, %v429_v2  ;;  %v413_v14 = vsel %vm409_vm8, %v408_v58, %v353_v51  ;;  %v1405_v29 = vld [vmem:[%s6564_s7] sm:$0xff]  ;;  %v1406_v58 = vld [vmem:[%s6564_s7 + $0x8] sm:$0xff]  ;;  %v6036_v47 = vsub.s32 5, %v5552_v1 }
  0xba   :  { %v417_v60 = vsel %vm414_vm12, %v412_v44, %v364_v21  ;;  %v388_v56 = vrot.slane %v282_v50, 1  ;;  %v389_v15 = vrot.slane %v283_v31, 1  ;;  %4466 = vmatprep.subr.msk.mxu1 %vm394_vm4, %v300_v37  ;;  %v418_v45 = vsel %vm414_vm12, %v413_v14, %v365_v22  ;;  %581 = vmatprep.mubr.f32.mxu1 %v5475_v11 }
  0xbb   :  { %4467 = vmatpush1.msk.msra.mxu1 %vm394_vm4, %v299_v34  ;;  %v423_v52 = vsel %vm419_vm13, %v418_v45, %v377_v19  ;;  %v422_v32 = vsel %vm419_vm13, %v417_v60, %v376_v33  ;;  %v695_v21 = vrot.slane %v5643_v27, %v5585_v9  ;;  %v744_v37 = vsub.s32 4, %v5552_v1 }
  0xbc   :  { %v428_v46 = vsel %vm424_vm14, %v423_v52, %v389_v15  ;;  %v427_v51 = vsel %vm424_vm14, %v422_v32, %v388_v56  ;;  %v777_v50 = vrot.slane %v5638_v26, %v6036_v47  ;;  %v781_v31 = vrot.slane %v5643_v27, %v6036_v47 }
  0xbd   :  { %547 = vmatprep.subr.mxu1 %v428_v46  ;;  %v749_v60 = vrot.slane %v5643_v27, %v744_v37  ;;  %v745_v45 = vrot.slane %v5638_v26, %v744_v37  ;;  %v729_v46 = vrot.slane %v5643_v27, %v5560_v3 }
  0xbe   :  { %548 = vmatpush1.msra.mxu1 %v427_v51 }
  0xbf   :  { %4468 = vmatmul.mubr.msk.f32.vlgmr.msra.gmra.mxu1 %vm430_vm15, %v429_v2 }
  0xc0   :  { %868 = vmatprep.mubr.f32.mxu1 %v5475_v11 }
  0xc3   :  { %v592_v48 = vpop.permute.xlu0 %591  ;;  %v602_v54 = vpop.permute.xlu1 %601 }
 0x179   :  { %v512_v6 = vpop.f32.mrf.mxu1 }
 0x17a   :  { %v594_v55 = vmul.f32 %v592_v48, %v512_v6 }
 0x17b   :  { %v514_v39 = vpop.f32.mrf.mxu1 }
 0x17c   :  { %v604_v28 = vadd.f32 %v602_v54, %v594_v55  ;;  %v595_v0 = vmul.f32 %v592_v48, %v514_v39 }
 0x17e   :  { %v5931_v59 = vmax.f32 %v604_v28, 0.0  ;;  %v605_v8 = vadd.f32 %v602_v54, %v595_v0  ;;  %v725_v28 = vrot.slane %v5638_v26, %v5560_v3 }
 0x17f   :  { %v583_v18 = vpop.f32.mrf.mxu1 }
 0x180   :  { %710 = vrot.lane.b32.xlu0 %v5931_v59, %s5470_s29  ;;  %762 = vrot.lane.b32.xlu1 %v5931_v59, %s5471_s30  ;;  %v5937_v23 = vmax.f32 %v605_v8, 0.0  ;;  %v596_v62 = vmul.f32 %v592_v48, %v583_v18  ;;  %v758_v55 = vmul.f32 %v745_v45, %v5931_v59 }
 0x181   :  { %v585_v16 = vpop.f32.mrf.mxu1 }
 0x182   :  { %v606_v7 = vadd.f32 %v602_v54, %v596_v62  ;;  %v597_v61 = vmul.f32 %v592_v48, %v585_v16  ;;  %v759_v6 = vmul.f32 %v749_v60, %v5937_v23  ;;  %v6070_v62 = vld [vmem:[%s6562_s5 + $0x10] sm:$0xff]  ;;  %v757_v16 = vrot.slane %v5633_v25, %v744_v37 }
 0x183   :  { %v733_v60 = vrot.slane %v5628_v24, %v5560_v3 }
 0x184   :  { %676 = vrot.lane.b32.xlu1 %v5931_v59, %s5468_s0  ;;  %678 = vrot.lane.b32.xlu0 %v5937_v23, %s5468_s0  ;;  %v5955_v63 = vmax.f32 %v606_v7, 0.0  ;;  %v607_v53 = vadd.f32 %v602_v54, %v597_v61  ;;  %v753_v61 = vrot.slane %v5628_v24, %v744_v37  ;;  %v785_v37 = vrot.slane %v5628_v24, %v6036_v47 }
 0x186   :  { %v5965_v17 = vmax.f32 %v607_v53, 0.0  ;;  %v6084_v53 = vld [vmem:[%s6562_s5 + $0x18] sm:$0xff] }
 0x188   :  { %644 = vrot.lane.b32.xlu1 %v5931_v59, %s5467_s27  ;;  %646 = vrot.lane.b32.xlu0 %v5937_v23, %s5467_s27 }
 0x18c   :  { %612 = vrot.lane.b32.xlu1 %v5931_v59, %s5469_s28  ;;  %614 = vrot.lane.b32.xlu0 %v5937_v23, %s5469_s28 }
 0x190   :  { %1182 = vrot.lane.b32.xlu1 %v5931_v59, %s5474_s16  ;;  %1184 = vrot.lane.b32.xlu0 %v5937_v23, %s5474_s16 }
 0x194   :  { %764 = vrot.lane.b32.xlu1 %v5937_v23, %s5471_s30  ;;  %766 = vrot.lane.b32.xlu0 %v5955_v63, %s5471_s30 }
 0x198   :  { %712 = vrot.lane.b32.xlu1 %v5937_v23, %s5470_s29  ;;  %714 = vrot.lane.b32.xlu0 %v5955_v63, %s5470_s29 }
 0x19c   :  { %680 = vrot.lane.b32.xlu1 %v5955_v63, %s5468_s0  ;;  %716 = vrot.lane.b32.xlu0 %v5965_v17, %s5470_s29 }
 0x1a0   :  { %648 = vrot.lane.b32.xlu1 %v5955_v63, %s5467_s27  ;;  %1152 = vrot.lane.b32.xlu0 %v5937_v23, %s5473_s15 }
 0x1a4   :  { %616 = vrot.lane.b32.xlu1 %v5955_v63, %s5469_s28  ;;  %1120 = vrot.lane.b32.xlu0 %v5937_v23, %s5472_s14 }
 0x1a8   :  { %768 = vrot.lane.b32.xlu1 %v5965_v17, %s5471_s30  ;;  %682 = vrot.lane.b32.xlu0 %v5965_v17, %s5468_s0 }
 0x1ac   :  { %1186 = vrot.lane.b32.xlu1 %v5955_v63, %s5474_s16  ;;  %650 = vrot.lane.b32.xlu0 %v5965_v17, %s5467_s27 }
 0x1b0   :  { %1150 = vrot.lane.b32.xlu1 %v5931_v59, %s5473_s15  ;;  %618 = vrot.lane.b32.xlu0 %v5965_v17, %s5469_s28 }
 0x1b4   :  { %1154 = vrot.lane.b32.xlu1 %v5955_v63, %s5473_s15  ;;  %1188 = vrot.lane.b32.xlu0 %v5965_v17, %s5474_s16 }
 0x1b8   :  { %1118 = vrot.lane.b32.xlu1 %v5931_v59, %s5472_s14  ;;  %1156 = vrot.lane.b32.xlu0 %v5965_v17, %s5473_s15 }
 0x1bc   :  { %1122 = vrot.lane.b32.xlu1 %v5955_v63, %s5472_s14  ;;  %1124 = vrot.lane.b32.xlu0 %v5965_v17, %s5472_s14 }
 0x1c0   :  { %1389 = vperm.xlu1 %5164, %v1385_v38   ;;  %1394 = vperm.xlu0 %5163, %v1386_v35   ;;  %v1201_v38 = vrot.slane %v5835_v43, %v5563_v4  ;;  %v663_v35 = vrot.slane %v5643_v27, %v5566_v5 }
 0x1c4   :  { %1409 = vperm.xlu1 %5164, %v1405_v29   ;;  %1414 = vperm.xlu0 %5163, %v1406_v58  }
 0x1f2   :  { %v711_v13 = vpop.permute.xlu0 %710  ;;  %v6015_v10 = vpop.permute.xlu1 %762 }
 0x1f6   :  { %v6019_v22 = vpop.permute.xlu1 %676  ;;  %v6021_v33 = vpop.permute.xlu0 %678 }
 0x1f7   :  { %v686_v19 = vsel %vm141_vm3, %v6019_v22, %v6021_v33 }
 0x1f8   :  { %v705_v36 = vmul.f32 %v695_v21, %v686_v19  ;;  %v1197_v21 = vrot.slane %v5853_v49, %v5563_v4  ;;  %v761_v19 = vmul.f32 %v757_v16, %v5965_v17  ;;  %v737_v17 = vrot.slane %v5633_v25, %v5560_v3 }
 0x1f9   :  { %v639_v16 = vrot.slane %v5633_v25, %v5563_v4 }
 0x1fa   :  { %v6027_v20 = vpop.permute.xlu1 %644  ;;  %990 = vmatprep.subr.mxu0 %v705_v36  ;;  %v6029_v2 = vpop.permute.xlu0 %646  ;;  %v760_v36 = vmul.f32 %v753_v61, %v5955_v63  ;;  %v699_v63 = vrot.slane %v5628_v24, %v5585_v9 }
 0x1fe   :  { %v6031_v40 = vpop.permute.xlu1 %612  ;;  %v6033_v42 = vpop.permute.xlu0 %614 }
 0x202   :  { %v6038_v30 = vpop.permute.xlu1 %1182  ;;  %v6040_v34 = vpop.permute.xlu0 %1184 }
 0x206   :  { %v765_v44 = vpop.permute.xlu1 %764  ;;  %v767_v14 = vpop.permute.xlu0 %766 }
 0x207   :  { %v772_v56 = vsel %vm217_vm7, %v6015_v10, %v765_v44  ;;  %v771_v15 = vsel %vm217_vm7, %v765_v44, %v767_v14  ;;  %v6109_v44 = vsub.s32 7, %v5552_v1 }
 0x208   :  { %v790_v52 = vmul.f32 %v777_v50, %v772_v56  ;;  %v791_v32 = vmul.f32 %v781_v31, %v771_v15  ;;  %v789_v50 = vrot.slane %v5633_v25, %v6036_v47  ;;  %v691_v31 = vrot.slane %v5638_v26, %v5585_v9 }
 0x209   :  { %v667_v47 = vrot.slane %v5628_v24, %v5566_v5  ;;  %v654_v56 = vsel %vm112_vm0, %v6027_v20, %v6029_v2  ;;  %v635_v15 = vrot.slane %v5628_v24, %v5563_v4 }
 0x20a   :  { %v6056_v51 = vpop.permute.xlu1 %712  ;;  %830 = vmatprep.subr.mxu1 %v791_v32  ;;  %v715_v48 = vpop.permute.xlu0 %714 }
 0x20b   :  { %v720_v54 = vsel %vm166_vm2, %v711_v13, %v6056_v51  ;;  %831 = vmatpush1.msra.mxu1 %v790_v52  ;;  %v703_v52 = vrot.slane %v5633_v25, %v5585_v9 }
 0x20c   :  { %v739_v39 = vmul.f32 %v729_v46, %v720_v54  ;;  %832 = vmatprep.subr.mxu1 %v759_v6  ;;  %v659_v46 = vrot.slane %v5638_v26, %v5566_v5 }
 0x20d   :  { %833 = vmatpush1.msra.mxu1 %v758_v55  ;;  %v671_v55 = vrot.slane %v5633_v25, %v5566_v5  ;;  %v622_v5 = vsel %vm95_vm1, %v6031_v40, %v6033_v42 }
 0x20e   :  { %v681_v0 = vpop.permute.xlu1 %680  ;;  %834 = vmatprep.subr.mxu1 %v739_v39  ;;  %v717_v8 = vpop.permute.xlu0 %716 }
 0x20f   :  { %v721_v18 = vsel %vm166_vm2, %v717_v8, %v711_v13  ;;  %v631_v13 = vrot.slane %v5643_v27, %v5563_v4 }
 0x210   :  { %v738_v23 = vmul.f32 %v725_v28, %v721_v18  ;;  %v1165_v18 = vrot.slane %v5638_v26, %v6109_v44 }
 0x212   :  { %v6072_v59 = vpop.permute.xlu1 %648  ;;  %835 = vmatpush1.msra.mxu1 %v738_v23  ;;  %v6074_v7 = vpop.permute.xlu0 %1152  ;;  %v673_v23 = vmul.f32 %v663_v35, %v654_v56  ;;  %v1205_v56 = vrot.slane %v5882_v57, %v5563_v4 }
 0x213   :  { %4471 = vmatmul.mubr.msk.f32.vlgmr.msra.gmra.mxu1 %vm797_vm5, %v6070_v62 }
 0x214   :  { %874 = vmatprep.mubr.f32.mxu1 %v5475_v11 }
 0x216   :  { %v6090_v29 = vpop.permute.xlu1 %616  ;;  %v6092_v58 = vpop.permute.xlu0 %1120 }
 0x217   :  { %4472 = vmatmul.mubr.msk.f32.gmra.mxu1 %vm797_vm5, %v6084_v53 }
 0x218   :  { %945 = vmatprep.mubr.f32.mxu1 %v5475_v11 }
 0x21a   :  { %v769_v45 = vpop.permute.xlu1 %768  ;;  %v683_v32 = vpop.permute.xlu0 %682 }
 0x21b   :  { %v770_v3 = vsel %vm217_vm7, %v767_v14, %v769_v45  ;;  %v773_v6 = vsel %vm217_vm7, %v769_v45, %v6015_v10  ;;  %v687_v54 = vsel %vm141_vm3, %v683_v32, %v6019_v22  ;;  %v718_v14 = vsel %vm166_vm2, %v715_v48, %v717_v8 }
 0x21c   :  { %v792_v39 = vmul.f32 %v785_v37, %v770_v3  ;;  %v793_v9 = vmul.f32 %v789_v50, %v773_v6  ;;  %v704_v28 = vmul.f32 %v691_v31, %v687_v54  ;;  %v627_v10 = vrot.slane %v5638_v26, %v5563_v4 }
 0x21d   :  { %v719_v22 = vsel %vm166_vm2, %v6056_v51, %v715_v48  ;;  %v1169_v8 = vrot.slane %v5643_v27, %v6109_v44  ;;  %v685_v37 = vsel %vm141_vm3, %v6021_v33, %v681_v0  ;;  %v684_v50 = vsel %vm141_vm3, %v681_v0, %v683_v32 }
 0x21e   :  { %v1187_v61 = vpop.permute.xlu1 %1186  ;;  %907 = vmatprep.subr.mxu1 %v793_v9  ;;  %991 = vmatpush1.msra.mxu0 %v704_v28  ;;  %v651_v35 = vpop.permute.xlu0 %650  ;;  %v741_v51 = vmul.f32 %v737_v17, %v718_v14  ;;  %v1209_v45 = vrot.slane %v5887_v12, %v5563_v4  ;;  %v641_v3 = vmul.f32 %v631_v13, %v622_v5 }
 0x21f   :  { %v655_v31 = vsel %vm112_vm0, %v651_v35, %v6027_v20  ;;  %908 = vmatpush1.msra.mxu1 %v792_v39  ;;  %992 = vmatprep.subr.mxu0 %v673_v23  ;;  %v1192_v33 = vsel %vm292_vm11, %v6038_v30, %v6040_v34  ;;  %v740_v0 = vmul.f32 %v733_v60, %v719_v22 }
 0x220   :  { %v672_v48 = vmul.f32 %v659_v46, %v655_v31  ;;  %909 = vmatprep.subr.mxu1 %v761_v19  ;;  %v652_v20 = vsel %vm112_vm0, %v6072_v59, %v651_v35  ;;  %v706_v17 = vmul.f32 %v699_v63, %v685_v37  ;;  %v653_v19 = vsel %vm112_vm0, %v6029_v2, %v6072_v59 }
 0x221   :  { %910 = vmatpush1.msra.mxu1 %v760_v36  ;;  %v707_v32 = vmul.f32 %v703_v52, %v684_v50  ;;  %v621_v60 = vsel %vm95_vm1, %v6033_v42, %v6090_v29  ;;  %v1191_v36 = vsel %vm292_vm11, %v6040_v34, %v1187_v61  ;;  %v675_v2 = vmul.f32 %v671_v55, %v652_v20  ;;  %v708_v42 = vld [vmem:[%s6562_s5] sm:$0xff] }
 0x222   :  { %v1151_v12 = vpop.permute.xlu1 %1150  ;;  %993 = vmatpush1.msra.mxu0 %v672_v48  ;;  %v619_v13 = vpop.permute.xlu0 %618  ;;  %911 = vmatprep.subr.mxu1 %v741_v51  ;;  %v674_v34 = vmul.f32 %v667_v47, %v653_v19  ;;  %v1177_v46 = vrot.slane %v5633_v25, %v6109_v44  ;;  %v1211_v47 = vmul.f32 %v1201_v38, %v1191_v36 }
 0x223   :  { %v623_v63 = vsel %vm95_vm1, %v619_v13, %v6031_v40  ;;  %912 = vmatpush1.msra.mxu1 %v740_v0  ;;  %994 = vmatprep.subr.mxu0 %v641_v3  ;;  %v620_v59 = vsel %vm95_vm1, %v6090_v29, %v619_v13  ;;  %v1173_v40 = vrot.slane %v5628_v24, %v6109_v44 }
 0x224   :  { %v640_v52 = vmul.f32 %v627_v10, %v623_v63  ;;  %4473 = vmatmul.mubr.msk.f32.vlgmr.msra.gmra.mxu1 %vm797_vm5, %v6070_v62  ;;  %1067 = vmatprep.subr.mxu1 %v707_v32  ;;  %v1210_v29 = vmul.f32 %v1197_v21, %v1192_v33  ;;  %v642_v62 = vmul.f32 %v635_v15, %v621_v60  ;;  %v1132_v15 = vsub.s32 6, %v5552_v1 }
 0x225   :  { %1068 = vmatpush1.msra.mxu1 %v706_v17  ;;  %951 = vmatprep.mubr.f32.mxu1 %v5475_v11  ;;  %v643_v55 = vmul.f32 %v639_v16, %v620_v59  ;;  %v1160_v43 = vsel %vm267_vm10, %v1151_v12, %v6074_v7 }
 0x226   :  { %v1155_v6 = vpop.permute.xlu1 %1154  ;;  %995 = vmatpush1.msra.mxu0 %v640_v52  ;;  %v1189_v54 = vpop.permute.xlu0 %1188  ;;  %1069 = vmatprep.subr.mxu1 %v675_v2  ;;  %v1137_v23 = vrot.slane %v5643_v27, %v1132_v15  ;;  %v1145_v1 = vrot.slane %v5633_v25, %v1132_v15  ;;  %v1178_v14 = vmul.f32 %v1165_v18, %v1160_v43 }
 0x227   :  { %v1159_v39 = vsel %vm267_vm10, %v6074_v7, %v1155_v6  ;;  %v1193_v49 = vsel %vm292_vm11, %v1189_v54, %v6038_v30  ;;  %4475 = vmatmul.mubr.msk.f32.vlgmr.msra.gmra.mxu0 %vm797_vm5, %v708_v42  ;;  %1070 = vmatpush1.msra.mxu1 %v674_v34  ;;  %v1190_v9 = vsel %vm292_vm11, %v1187_v61, %v1189_v54  ;;  %v709_v30 = vld [vmem:[%s6562_s5 + $0x8] sm:$0xff] }
 0x228   :  { %v1179_v38 = vmul.f32 %v1169_v8, %v1159_v39  ;;  %v1213_v21 = vmul.f32 %v1209_v45, %v1193_v49  ;;  %1249 = vmatprep.subr.mxu0 %v1211_v47  ;;  %4474 = vmatmul.mubr.msk.f32.gmra.mxu1 %vm797_vm5, %v6084_v53  ;;  %v1141_v53 = vrot.slane %v5628_v24, %v1132_v15 }
 0x229   :  { %1071 = vmatprep.subr.mxu1 %v643_v55  ;;  %1250 = vmatpush1.msra.mxu0 %v1210_v29  ;;  %v1212_v27 = vmul.f32 %v1205_v56, %v1190_v9  ;;  %v1133_v25 = vrot.slane %v5638_v26, %v1132_v15 }
 0x22a   :  { %1072 = vmatpush1.msra.mxu1 %v642_v62  ;;  %v1119_v28 = vpop.permute.xlu1 %1118  ;;  %1034 = vmatprep.mubr.f32.mxu0 %v5475_v11  ;;  %v1157_v7 = vpop.permute.xlu0 %1156 }
 0x22b   :  { %1251 = vmatprep.subr.mxu0 %v1179_v38  ;;  %v1158_v10 = vsel %vm267_vm10, %v1155_v6, %v1157_v7  ;;  %v1161_v16 = vsel %vm267_vm10, %v1157_v7, %v1151_v12  ;;  %1326 = vmatprep.subr.mxu1 %v1213_v21  ;;  %v1128_v44 = vsel %vm242_vm9, %v1119_v28, %v6092_v58 }
 0x22c   :  { %v1180_v5 = vmul.f32 %v1173_v40, %v1158_v10  ;;  %v1181_v24 = vmul.f32 %v1177_v46, %v1161_v16  ;;  %4476 = vmatmul.mubr.msk.f32.gmra.mxu0 %vm797_vm5, %v709_v30  ;;  %1105 = vmatprep.mubr.f32.mxu1 %v5475_v11  ;;  %v1146_v37 = vmul.f32 %v1133_v25, %v1128_v44 }
 0x22d   :  { %1252 = vmatpush1.msra.mxu0 %v1178_v14  ;;  %4477 = vmatmul.mubr.msk.f32.vlgmr.msra.gmra.mxu1 %vm797_vm5, %v708_v42 }
 0x22e   :  { %1327 = vmatpush1.msra.mxu1 %v1212_v27  ;;  %v1123_v18 = vpop.permute.xlu1 %1122  ;;  %v1125_v22 = vpop.permute.xlu0 %1124  ;;  %1111 = vmatprep.mubr.f32.mxu1 %v5475_v11 }
 0x22f   :  { %v1127_v4 = vsel %vm242_vm9, %v6092_v58, %v1123_v18  ;;  %v1126_v57 = vsel %vm242_vm9, %v1123_v18, %v1125_v22  ;;  %v1129_v26 = vsel %vm242_vm9, %v1125_v22, %v1119_v28  ;;  %1328 = vmatprep.subr.mxu1 %v1181_v24  ;;  %1287 = vmatprep.mubr.f32.mxu0 %v5475_v11  ;;  %v4479_v58 = vld [vmem:[%s6562_s5 + $0x20] sm:$0xff] }
 0x230   :  { %v1147_v61 = vmul.f32 %v1137_v23, %v1127_v4  ;;  %v1148_v35 = vmul.f32 %v1141_v53, %v1126_v57  ;;  %v1149_v8 = vmul.f32 %v1145_v1, %v1129_v26  ;;  %1329 = vmatpush1.msra.mxu1 %v1180_v5 }
 0x231   :  { %4478 = vmatmul.mubr.msk.f32.gmra.mxu1 %vm797_vm5, %v709_v30 }
 0x232   :  { %1253 = vmatprep.subr.mxu0 %v1147_v61  ;;  %1330 = vmatprep.subr.mxu1 %v1149_v8 }
 0x233   :  { %1254 = vmatpush1.msra.mxu0 %v1146_v37  ;;  %1331 = vmatpush1.msra.mxu1 %v1148_v35 }
 0x234   :  { %1364 = vmatprep.mubr.f32.mxu1 %v5475_v11  ;;  %4481 = vmatmul.mubr.msk.f32.vlgmr.msra.gmra.mxu0 %vm797_vm5, %v4479_v58 }
 0x235   :  { %4483 = vmatmul.mubr.msk.f32.vlgmr.msra.gmra.mxu1 %vm797_vm5, %v4479_v58  ;;  %1293 = vmatprep.mubr.f32.mxu0 %v5475_v11 }
 0x236   :  { %1370 = vmatprep.mubr.f32.mxu1 %v5475_v11 }
 0x238   :  { %4482 = vmatmul.mubr.msk.f32.gmra.mxu0 %vm797_vm5, %v4480_v41 }
 0x239   :  { %4484 = vmatmul.mubr.msk.f32.gmra.mxu1 %vm797_vm5, %v4480_v41 }
 0x23a   :  { %5442 = shalt.err (!%p5439_p4)  }
 0x23b   :  { %54 = dma.hbm_to_vmem [thread:$0]  %s6565_s8, 32768, %s52_s22, [#allocation3]  ;;  %v1390_v13 = vpop.permute.xlu1 %1389  ;;  %v1395_v40 = vpop.permute.xlu0 %1394 }
 0x23f   :  { %v1410_v39 = vpop.permute.xlu1 %1409  ;;  %v1415_v44 = vpop.permute.xlu0 %1414 }
 0x2d3   :  { %v870_v50 = vpop.f32.mrf.mxu1 }
 0x2d5   :  { %v872_v31 = vpop.f32.mrf.mxu1 }
 0x2d7   :  { %v876_v51 = vpop.f32.mrf.mxu1 }
 0x2d9   :  { %v878_v48 = vpop.f32.mrf.mxu1 }
 0x2e4   :  { %v947_v56 = vpop.f32.mrf.mxu1 }
 0x2e6   :  { %v949_v45 = vpop.f32.mrf.mxu1 }
 0x2e7   :  { %v1030_v3 = vpop.f32.mrf.mxu0 }
 0x2e8   :  { %v953_v33 = vpop.f32.mrf.mxu1  ;;  %v1031_v36 = vadd.f32 %v1030_v3, %v870_v50 }
 0x2e9   :  { %v1032_v0 = vpop.f32.mrf.mxu0 }
 0x2ea   :  { %v955_v20 = vpop.f32.mrf.mxu1  ;;  %v1033_v52 = vadd.f32 %v1032_v0, %v872_v31 }
 0x2ec   :  { %v1036_v19 = vpop.f32.mrf.mxu0 }
 0x2ed   :  { %v1107_v17 = vpop.f32.mrf.mxu1  ;;  %v1037_v47 = vadd.f32 %v1036_v19, %v876_v51 }
 0x2ee   :  { %v1038_v60 = vpop.f32.mrf.mxu0  ;;  %v1108_v2 = vadd.f32 %v1107_v17, %v947_v56 }
 0x2ef   :  { %v1109_v32 = vpop.f32.mrf.mxu1  ;;  %v1039_v15 = vadd.f32 %v1038_v60, %v878_v48 }
 0x2f0   :  { %v1110_v46 = vadd.f32 %v1109_v32, %v949_v45 }
 0x2f1   :  { %v1113_v12 = vpop.f32.mrf.mxu1 }
 0x2f2   :  { %v1114_v49 = vadd.f32 %v1113_v12, %v953_v33 }
 0x2f3   :  { %v1115_v63 = vpop.f32.mrf.mxu1 }
 0x2f4   :  { %v1289_v59 = vpop.f32.mrf.mxu0  ;;  %v1116_v23 = vadd.f32 %v1115_v63, %v955_v20 }
 0x2f5   :  { %v1377_v42 = vadd.f32 %v1289_v59, %v1031_v36  ;;  %v1366_v34 = vpop.f32.mrf.mxu1 }
 0x2f6   :  { %v1379_v29 = vadd.f32 %v1366_v34, %v1108_v2  ;;  %v1291_v62 = vpop.f32.mrf.mxu0 }
 0x2f7   :  { %v1397_v6 = vmul.f32 %v1390_v13, %v1377_v42  ;;  %v1378_v54 = vadd.f32 %v1291_v62, %v1033_v52  ;;  %v1368_v55 = vpop.f32.mrf.mxu1 }
 0x2f8   :  { %v1399_v43 = vmul.f32 %v1390_v13, %v1379_v29  ;;  %v1380_v38 = vadd.f32 %v1368_v55, %v1110_v46  ;;  %v1295_v21 = vpop.f32.mrf.mxu0 }
 0x2f9   :  { %v1417_v9 = vadd.f32 %v1410_v39, %v1397_v6  ;;  %v1398_v30 = vmul.f32 %v1390_v13, %v1378_v54  ;;  %v1381_v28 = vadd.f32 %v1295_v21, %v1037_v47  ;;  %v1372_v7 = vpop.f32.mrf.mxu1 }
 0x2fa   :  { %v1419_v53 = vadd.f32 %v1410_v39, %v1399_v43  ;;  %v1400_v1 = vmul.f32 %v1390_v13, %v1380_v38  ;;  %v1383_v14 = vadd.f32 %v1372_v7, %v1114_v49  ;;  %v1297_v10 = vpop.f32.mrf.mxu0 }
 0x2fb   :  { %v6277_v16 = vmax.f32 %v1417_v9, 0.0  ;;  %v1418_v27 = vadd.f32 %v1410_v39, %v1398_v30  ;;  %v1401_v5 = vmul.f32 %v1395_v40, %v1381_v28  ;;  %v1382_v24 = vadd.f32 %v1297_v10, %v1039_v15  ;;  %v1374_v25 = vpop.f32.mrf.mxu1 }
 0x2fc   :  { %v6279_v18 = vmax.f32 %v1419_v53, 0.0  ;;  %v1420_v22 = vadd.f32 %v1410_v39, %v1400_v1  ;;  %v1403_v4 = vmul.f32 %v1395_v40, %v1383_v14  ;;  %v1384_v57 = vadd.f32 %v1374_v25, %v1116_v23 }
 0x2fd   :  { %v6281_v26 = vmax.f32 %v1418_v27, 0.0  ;;  %v1421_v61 = vadd.f32 %v1415_v44, %v1401_v5  ;;  %v1402_v35 = vmul.f32 %v1395_v40, %v1382_v24 }
 0x2fe   :  { %v6283_v8 = vmax.f32 %v1420_v22, 0.0  ;;  %v1423_v37 = vadd.f32 %v1415_v44, %v1403_v4  ;;  %v1404_v58 = vmul.f32 %v1395_v40, %v1384_v57 }
 0x2ff   :  { %v6285_v41 = vmax.f32 %v1421_v61, 0.0  ;;  %v1422_v50 = vadd.f32 %v1415_v44, %v1402_v35 }
 0x300   :  { %v6287_v31 = vmax.f32 %v1423_v37, 0.0  ;;  %v1424_v51 = vadd.f32 %v1415_v44, %v1404_v58 }
 0x301   :  { %v6289_v48 = vmax.f32 %v1422_v50, 0.0 }
 0x302   :  { %v6291_v56 = vmax.f32 %v1424_v51, 0.0 }
 0x303   :  { %5463 = dma.done.wait [#allocation3], 32768 }
 0x304   :  { %5464 = vsyncadd [#allocation3], 4294934528  ;;  %v6294_v45 = vrot.slane %v6283_v8, 3  ;;  %v1621_v3 = vrot.slane %v6281_v26, 4  ;;  %v1441_v33 = vrot.slane %v6281_v26, 1  ;;  %v1455_v0 = vrot.slane %v6283_v8, 1 }
 0x305   :  { %v6303_v60 = vrot.slane %v6279_v18, 3  ;;  %v5167_v36 = vld [vmem:[#allocation2 + $0x278] sm:$0xff]   ;;  %v1440_v63 = vrot.slane %v6277_v16, 1  ;;  %v1454_v59 = vrot.slane %v6279_v18, 1  ;;  %v1445_v42 = vrot.slane %v6281_v26, 2  ;;  %v5171_v46 = vld [vmem:[#allocation2 + $0x270] sm:$0xff]  }
 0x306   :  { %v1651_v20 = vsel %vm394_vm4, %v1621_v3, %v6294_v45  ;;  %v1623_v17 = vrot.slane %v1441_v33, 4  ;;  %v1637_v19 = vrot.slane %v1455_v0, 3  ;;  %v5168_v2 = vld [vmem:[#allocation2 + $0x2f8] sm:$0xff]   ;;  %4745 = vmatprep.subr.bf16.mxu0 %v5167_v36  ;;  %v1457_v40 = vrot.slane %v6283_v8, 2  ;;  %v5172_v62 = vld [vmem:[#allocation2 + $0x2f0] sm:$0xff]   ;;  %v5175_v49 = vld [vmem:[#allocation2 + $0x268] sm:$0xff]  }
 0x307   :  { %v1659_v32 = vpack.c.bf16 %v1651_v20, %v1651_v20  ;;  %v5169_v52 = vld [vmem:[#allocation2 + $0x238] sm:$0xff]   ;;  %4767 = vmatprep.subr.bf16.mxu1 %v5168_v2  ;;  %v1449_v29 = vrot.slane %v6281_v26, 3  ;;  %v1444_v47 = vrot.slane %v6277_v16, 2  ;;  %v5173_v6 = vld [vmem:[#allocation2 + $0x230] sm:$0xff]   ;;  %v1456_v54 = vrot.slane %v6279_v18, 2  ;;  %v5176_v38 = vld [vmem:[#allocation2 + $0x2e8] sm:$0xff]  }
 0x308   :  { %v1653_v12 = vsel %vm394_vm4, %v1623_v17, %v1637_v19  ;;  %v5170_v34 = vld [vmem:[#allocation2 + $0x2b8] sm:$0xff]   ;;  %4746 = vmatpush3.bf16.msra.mxu0 %v5169_v52  ;;  %v5174_v55 = vld [vmem:[#allocation2 + $0x2b0] sm:$0xff]   ;;  %v1463_v39 = vrot.slane %v1455_v0, 7  ;;  %v1448_v43 = vrot.slane %v6277_v16, 3  ;;  %v1462_v15 = vrot.slane %v1454_v59, 7  ;;  %v5177_v9 = vld [vmem:[#allocation2 + $0x228] sm:$0xff]  }
 0x309   :  { %2211 = vmatprep.mubr.bf16.mxu0 %v1659_v32  ;;  %v1661_v13 = vpack.c.bf16 %v1653_v12, %v1653_v12  ;;  %4768 = vmatpush3.bf16.msra.mxu1 %v5170_v34  ;;  %v1465_v30 = vrot.slane %v1457_v40, 7  ;;  %v5178_v28 = vld [vmem:[#allocation2 + $0x2a8] sm:$0xff]   ;;  %v1467_v23 = vrot.slane %v6294_v45, 7  ;;  %v5179_v53 = vld [vmem:[#allocation2 + $0x260] sm:$0xff]   ;;  %v1464_v14 = vrot.slane %v1456_v54, 7  ;;  %v5183_v4 = vld [vmem:[#allocation2 + $0x258] sm:$0xff]  }
 0x30a   :  { %4747 = vmatprep.subr.bf16.mxu0 %v5171_v46  ;;  %4769 = vmatprep.subr.bf16.mxu1 %v5172_v62  ;;  %v6314_v21 = vsel %vm394_vm4, %v1441_v33, %v1463_v39  ;;  %v6323_v7 = vsel %vm394_vm4, %v1440_v63, %v1462_v15  ;;  %v5180_v10 = vld [vmem:[#allocation2 + $0x2e0] sm:$0xff]   ;;  %v1466_v5 = vrot.slane %v6303_v60, 7  ;;  %v5184_v57 = vld [vmem:[#allocation2 + $0x2d8] sm:$0xff]   ;;  %v5187_v37 = vld [vmem:[#allocation2 + $0x250] sm:$0xff]   ;;  %v1620_v50 = vrot.slane %v6277_v16, 4  ;;  %s5480_s14 = smov [#allocation4]  }
 0x30b   :  { %2251 = vmatprep.mubr.bf16.mxu1 %v1661_v13  ;;  %v6329_v1 = vsel %vm394_vm4, %v1445_v42, %v1465_v30  ;;  %v6336_v27 = vsel %vm394_vm4, %v1449_v29, %v1467_v23  ;;  %v5181_v24 = vld [vmem:[#allocation2 + $0x220] sm:$0xff]   ;;  %v6342_v25 = vsel %vm394_vm4, %v1444_v47, %v1464_v14  ;;  %v5185_v61 = vld [vmem:[#allocation2 + $0x218] sm:$0xff]   ;;  %v5188_v58 = vld [vmem:[#allocation2 + $0x2d0] sm:$0xff]   ;;  %v1622_v3 = vrot.slane %v1440_v63, 4  ;;  %s4449_s16 = sshll.u32 %s5480_s14, 4  ;;  %s4450_s16 = int_to_ptr.vmem [resolvable:$true] %s4449_s16 }
 0x30c   :  { %4748 = vmatpush3.bf16.msra.mxu0 %v5173_v6  ;;  %v5182_v44 = vld [vmem:[#allocation2 + $0x2a0] sm:$0xff]   ;;  %v6347_v22 = vsel %vm394_vm4, %v1448_v43, %v1466_v5  ;;  %v5186_v35 = vld [vmem:[#allocation2 + $0x298] sm:$0xff]   ;;  %v5189_v51 = vld [vmem:[#allocation2 + $0x210] sm:$0xff]   ;;  %v1636_v0 = vrot.slane %v1454_v59, 3  ;;  %v1625_v17 = vrot.slane %v1445_v42, 4  ;;  %v1641_v32 = vrot.slane %v6294_v45, 3  ;;  %p5448_p6 = scmp.lt.s32.totalorder %s4450_s16, %s4450_s16 }
 0x30d   :  { %4770 = vmatpush3.bf16.msra.mxu1 %v5174_v55  ;;  %4749 = vmatprep.subr.bf16.mxu0 %v5175_v49  ;;  %v5190_v33 = vld [vmem:[#allocation2 + $0x290] sm:$0xff]   ;;  %v5191_v20 = vld [vmem:[#allocation2 + $0x248] sm:$0xff]   ;;  %v1639_v13 = vrot.slane %v1457_v40, 3  ;;  %v1627_v63 = vrot.slane %v1449_v29, 4  ;;  %v5195_v2 = vld [vmem:[#allocation2 + $0x240] sm:$0xff]   ;;  %v1650_v59 = vsel %vm394_vm4, %v1620_v50, %v6303_v60  ;;  %vm5479_vm0 = vmmov 0  }
 0x30e   :  { %4771 = vmatprep.subr.bf16.mxu1 %v5176_v38  ;;  %v5192_v19 = vld [vmem:[#allocation2 + $0x2c8] sm:$0xff]   ;;  %v5196_v52 = vld [vmem:[#allocation2 + $0x2c0] sm:$0xff]   ;;  %v1652_v42 = vsel %vm394_vm4, %v1622_v3, %v1636_v0  ;;  %v1658_v46 = vpack.c.bf16 %v1650_v59, %v1650_v59  ;;  %v5199_v6 = vld [vmem:[#allocation2 + $0x378] sm:$0xff]   ;;  %vm4441_vm1 = vcmask 74752  }
 0x30f   :  { %v5193_v12 = vld [vmem:[#allocation2 + $0x208] sm:$0xff]   ;;  %v5197_v45 = vld [vmem:[#allocation2 + $0x200] sm:$0xff]   ;;  %v1655_v34 = vsel %vm394_vm4, %v1625_v17, %v1639_v13  ;;  %v1657_v62 = vsel %vm394_vm4, %v1627_v63, %v1641_v32  ;;  %v1660_v29 = vpack.c.bf16 %v1652_v42, %v1652_v42  ;;  %v5200_v55 = vld [vmem:[#allocation2 + $0x3f8] sm:$0xff]  }
 0x310   :  { %4750 = vmatpush3.bf16.msra.mxu0 %v5177_v9  ;;  %v5194_v36 = vld [vmem:[#allocation2 + $0x288] sm:$0xff]   ;;  %v5198_v40 = vld [vmem:[#allocation2 + $0x280] sm:$0xff]   ;;  %v1663_v39 = vpack.c.bf16 %v1655_v34, %v1655_v34  ;;  %v5201_v49 = vld [vmem:[#allocation2 + $0x338] sm:$0xff]   ;;  %v1665_v38 = vpack.c.bf16 %v1657_v62, %v1657_v62  ;;  %v1487_v62 = vpack.c.bf16 %v6314_v21, %v6314_v21 }
 0x311   :  { %4772 = vmatpush3.bf16.msra.mxu1 %v5178_v28  ;;  %4751 = vmatprep.subr.bf16.mxu0 %v5179_v53  ;;  %v5202_v15 = vld [vmem:[#allocation2 + $0x3b8] sm:$0xff]   ;;  %v5203_v9 = vld [vmem:[#allocation2 + $0x370] sm:$0xff]   ;;  %v5207_v53 = vld [vmem:[#allocation2 + $0x368] sm:$0xff]  }
 0x312   :  { %4773 = vmatprep.subr.bf16.mxu1 %v5180_v10  ;;  %v5204_v30 = vld [vmem:[#allocation2 + $0x3f0] sm:$0xff]   ;;  %v5208_v14 = vld [vmem:[#allocation2 + $0x3e8] sm:$0xff]   ;;  %v5227_v63 = vld [vmem:[#allocation2 + $0x340] sm:$0xff]  }
 0x313   :  { %v5205_v28 = vld [vmem:[#allocation2 + $0x330] sm:$0xff]   ;;  %v5209_v10 = vld [vmem:[#allocation2 + $0x328] sm:$0xff]   ;;  %v5232_v34 = vld [vmem:[#allocation2 + $0xf8] sm:$0xff]  }
 0x314   :  { %4752 = vmatpush3.bf16.msra.mxu0 %v5181_v24  ;;  %v5206_v23 = vld [vmem:[#allocation2 + $0x3b0] sm:$0xff]   ;;  %v5210_v5 = vld [vmem:[#allocation2 + $0x3a8] sm:$0xff]   ;;  %v5211_v24 = vld [vmem:[#allocation2 + $0x360] sm:$0xff]  }
 0x315   :  { %4774 = vmatpush3.bf16.msra.mxu1 %v5182_v44  ;;  %4753 = vmatprep.subr.bf16.mxu0 %v5183_v4  ;;  %v5212_v44 = vld [vmem:[#allocation2 + $0x3e0] sm:$0xff]   ;;  %v5219_v50 = vld [vmem:[#allocation2 + $0x350] sm:$0xff]   ;;  %v5223_v17 = vld [vmem:[#allocation2 + $0x348] sm:$0xff]  }
 0x316   :  { %4775 = vmatprep.subr.bf16.mxu1 %v5184_v57  ;;  %v5213_v4 = vld [vmem:[#allocation2 + $0x320] sm:$0xff]   ;;  %v5221_v3 = vld [vmem:[#allocation2 + $0x310] sm:$0xff]   ;;  %v5224_v32 = vld [vmem:[#allocation2 + $0x3c8] sm:$0xff]  }
 0x317   :  { %v5214_v57 = vld [vmem:[#allocation2 + $0x3a0] sm:$0xff]   ;;  %v5222_v0 = vld [vmem:[#allocation2 + $0x390] sm:$0xff]   ;;  %v5225_v13 = vld [vmem:[#allocation2 + $0x308] sm:$0xff]  }
 0x318   :  { %4754 = vmatpush3.bf16.msra.mxu0 %v5185_v61  ;;  %v5215_v61 = vld [vmem:[#allocation2 + $0x358] sm:$0xff]   ;;  %v5241_v21 = vld [vmem:[#allocation2 + $0x28] sm:$0xff]  }
 0x319   :  { %4776 = vmatpush3.bf16.msra.mxu1 %v5186_v35  ;;  %4755 = vmatprep.subr.bf16.mxu0 %v5187_v37  ;;  %v5216_v35 = vld [vmem:[#allocation2 + $0x3d8] sm:$0xff]  }
 0x31a   :  { %4777 = vmatprep.subr.bf16.mxu1 %v5188_v58  ;;  %v5217_v37 = vld [vmem:[#allocation2 + $0x318] sm:$0xff]  }
 0x31b   :  { %v5218_v58 = vld [vmem:[#allocation2 + $0x398] sm:$0xff]  }
 0x31c   :  { %4756 = vmatpush3.bf16.msra.mxu0 %v5189_v51  ;;  %v5220_v51 = vld [vmem:[#allocation2 + $0x3d0] sm:$0xff]  }
 0x31d   :  { %4778 = vmatpush3.bf16.msra.mxu1 %v5190_v33  ;;  %4757 = vmatprep.subr.bf16.mxu0 %v5191_v20  ;;  %v1624_v33 = vrot.slane %v1444_v47, 4  ;;  %v1638_v20 = vrot.slane %v1456_v54, 3  ;;  %v5226_v47 = vld [vmem:[#allocation2 + $0x388] sm:$0xff]   ;;  %v5228_v54 = vld [vmem:[#allocation2 + $0x3c0] sm:$0xff]  }
 0x31e   :  { %4779 = vmatprep.subr.bf16.mxu1 %v5192_v19  ;;  %v1640_v19 = vrot.slane %v6303_v60, 3  ;;  %v5229_v60 = vld [vmem:[#allocation2 + $0x300] sm:$0xff]  }
 0x320   :  { %4758 = vmatpush3.bf16.msra.mxu0 %v5193_v12  ;;  %v1626_v12 = vrot.slane %v1448_v43, 4  ;;  %v5230_v43 = vld [vmem:[#allocation2 + $0x380] sm:$0xff]  }
 0x321   :  { %4780 = vmatpush3.bf16.msra.mxu1 %v5194_v36  ;;  %4759 = vmatprep.subr.bf16.mxu0 %v5195_v2  ;;  %v1461_v36 = vrot.slane %v6283_v8, 7  ;;  %v1654_v2 = vsel %vm394_vm4, %v1624_v33, %v1638_v20  ;;  %v5260_v33 = vld [vmem:[#allocation2 + $0xc0] sm:$0xff]  }
 0x322   :  { %4781 = vmatprep.subr.bf16.mxu1 %v5196_v52  ;;  %v1656_v59 = vsel %vm394_vm4, %v1626_v12, %v1640_v19  ;;  %v1662_v42 = vpack.c.bf16 %v1654_v2, %v1654_v2  ;;  %v5262_v20 = vld [vmem:[#allocation2 + $0x80] sm:$0xff]   ;;  %v5263_v19 = vld [vmem:[#allocation2 + $0x178] sm:$0xff]   ;;  %v1489_v12 = vpack.c.bf16 %v6329_v1, %v6329_v1  ;;  %v5270_v2 = vld [vmem:[#allocation2 + $0x1b0] sm:$0xff]  }
 0x323   :  { %v1477_v52 = vsel %vm394_vm4, %v6281_v26, %v1461_v36  ;;  %v1664_v8 = vpack.c.bf16 %v1656_v59, %v1656_v59  ;;  %v5235_v26 = vld [vmem:[#allocation2 + $0x70] sm:$0xff]   ;;  %v5266_v36 = vld [vmem:[#allocation2 + $0x1b8] sm:$0xff]   ;;  %v5271_v1 = vld [vmem:[#allocation2 + $0x168] sm:$0xff]  }
 0x324   :  { %4760 = vmatpush3.bf16.msra.mxu0 %v5197_v45  ;;  %v5231_v45 = vld [vmem:[#allocation2 + $0x78] sm:$0xff]   ;;  %v5274_v59 = vld [vmem:[#allocation2 + $0x1a8] sm:$0xff]  }
 0x325   :  { %4782 = vmatpush3.bf16.msra.mxu1 %v5198_v40  ;;  %4789 = vmatprep.subr.bf16.mxu0 %v5199_v6  ;;  %v1485_v40 = vpack.c.bf16 %v1477_v52, %v1477_v52  ;;  %v5236_v6 = vld [vmem:[#allocation2 + $0xf0] sm:$0xff]   ;;  %v5276_v52 = vld [vmem:[#allocation2 + $0x1e0] sm:$0xff]  }
 0x326   :  { %4811 = vmatprep.subr.bf16.mxu1 %v5200_v55  ;;  %v5237_v55 = vld [vmem:[#allocation2 + $0x30] sm:$0xff]  }
 0x327   :  { %2212 = vmatmul.mubr.bf16.vlgmr.msra.gmra.mxu0 %v1658_v46  ;;  %v5233_v46 = vld [vmem:[#allocation2 + $0x38] sm:$0xff]  }
 0x328   :  { %2252 = vmatmul.mubr.bf16.vlgmr.msra.gmra.mxu1 %v1660_v29  ;;  %4790 = vmatpush3.bf16.msra.mxu0 %v5201_v49  ;;  %v5234_v29 = vld [vmem:[#allocation2 + $0xb8] sm:$0xff]   ;;  %v5239_v49 = vld [vmem:[#allocation2 + $0x68] sm:$0xff]  }
 0x329   :  { %4812 = vmatpush3.bf16.msra.mxu1 %v5202_v15  ;;  %2291 = vmatprep.mubr.bf16.mxu0 %v1663_v39  ;;  %v5238_v39 = vld [vmem:[#allocation2 + $0xb0] sm:$0xff]   ;;  %v5242_v15 = vld [vmem:[#allocation2 + $0xa8] sm:$0xff]  }
 0x32a   :  { %4791 = vmatprep.subr.bf16.mxu0 %v5203_v9  ;;  %2331 = vmatprep.mubr.bf16.mxu1 %v1665_v38  ;;  %v5240_v38 = vld [vmem:[#allocation2 + $0xe8] sm:$0xff]   ;;  %v5243_v9 = vld [vmem:[#allocation2 + $0x60] sm:$0xff]  }
 0x32b   :  { %4813 = vmatprep.subr.bf16.mxu1 %v5204_v30  ;;  %v5244_v30 = vld [vmem:[#allocation2 + $0xe0] sm:$0xff]  }
 0x32c   :  { %4792 = vmatpush3.bf16.msra.mxu0 %v5205_v28  ;;  %v5245_v28 = vld [vmem:[#allocation2 + $0x20] sm:$0xff]  }
 0x32d   :  { %4814 = vmatpush3.bf16.msra.mxu1 %v5206_v23  ;;  %4793 = vmatprep.subr.bf16.mxu0 %v5207_v53  ;;  %v5246_v23 = vld [vmem:[#allocation2 + $0xa0] sm:$0xff]   ;;  %v5247_v53 = vld [vmem:[#allocation2 + $0x58] sm:$0xff]  }
 0x32e   :  { %4815 = vmatprep.subr.bf16.mxu1 %v5208_v14  ;;  %v5248_v14 = vld [vmem:[#allocation2 + $0xd8] sm:$0xff]  }
 0x330   :  { %4794 = vmatpush3.bf16.msra.mxu0 %v5209_v10  ;;  %v5249_v10 = vld [vmem:[#allocation2 + $0x18] sm:$0xff]  }
 0x331   :  { %4816 = vmatpush3.bf16.msra.mxu1 %v5210_v5  ;;  %4795 = vmatprep.subr.bf16.mxu0 %v5211_v24  ;;  %v5250_v5 = vld [vmem:[#allocation2 + $0x98] sm:$0xff]   ;;  %v5251_v24 = vld [vmem:[#allocation2 + $0x50] sm:$0xff]  }
 0x332   :  { %4817 = vmatprep.subr.bf16.mxu1 %v5212_v44  ;;  %v5252_v44 = vld [vmem:[#allocation2 + $0xd0] sm:$0xff]  }
 0x334   :  { %4796 = vmatpush3.bf16.msra.mxu0 %v5213_v4  ;;  %v5253_v4 = vld [vmem:[#allocation2 + $0x10] sm:$0xff]  }
 0x335   :  { %4818 = vmatpush3.bf16.msra.mxu1 %v5214_v57  ;;  %4797 = vmatprep.subr.bf16.mxu0 %v5215_v61  ;;  %v5254_v57 = vld [vmem:[#allocation2 + $0x90] sm:$0xff]   ;;  %v5255_v61 = vld [vmem:[#allocation2 + $0x48] sm:$0xff]  }
 0x336   :  { %4819 = vmatprep.subr.bf16.mxu1 %v5216_v35  ;;  %v1460_v35 = vrot.slane %v6279_v18, 7  ;;  %v1486_v18 = vpack.c.bf16 %v6323_v7, %v6323_v7  ;;  %v5269_v7 = vld [vmem:[#allocation2 + $0x130] sm:$0xff]  }
 0x338   :  { %4798 = vmatpush3.bf16.msra.mxu0 %v5217_v37  ;;  %v5256_v37 = vld [vmem:[#allocation2 + $0xc8] sm:$0xff]  }
 0x339   :  { %4820 = vmatpush3.bf16.msra.mxu1 %v5218_v58  ;;  %4799 = vmatprep.subr.bf16.mxu0 %v5219_v50  ;;  %v5257_v58 = vld [vmem:[#allocation2 + $0x8] sm:$0xff]  }
 0x33a   :  { %4821 = vmatprep.subr.bf16.mxu1 %v5220_v51  ;;  %v5258_v50 = vld [vmem:[#allocation2 + $0x88] sm:$0xff]   ;;  %v5259_v51 = vld [vmem:[#allocation2 + $0x40] sm:$0xff]  }
 0x33c   :  { %4800 = vmatpush3.bf16.msra.mxu0 %v5221_v3  ;;  %v1476_v3 = vsel %vm394_vm4, %v6277_v16, %v1460_v35  ;;  %v1491_v16 = vpack.c.bf16 %v6336_v27, %v6336_v27  ;;  %v5273_v27 = vld [vmem:[#allocation2 + $0x128] sm:$0xff]  }
 0x33d   :  { %4822 = vmatpush3.bf16.msra.mxu1 %v5222_v0  ;;  %4801 = vmatprep.subr.bf16.mxu0 %v5223_v17  ;;  %v5261_v0 = vld [vmem:[#allocation2] sm:$0xff]   ;;  %v1484_v17 = vpack.c.bf16 %v1476_v3, %v1476_v3  ;;  %v5304_v3 = vld [vmem:[#allocation2 + $0x4e8] sm:$0xff]  }
 0x33e   :  { %4823 = vmatprep.subr.bf16.mxu1 %v5224_v32  ;;  %v5264_v32 = vld [vmem:[#allocation2 + $0x1f8] sm:$0xff]  }
 0x340   :  { %4802 = vmatpush3.bf16.msra.mxu0 %v5225_v13  ;;  %v5265_v13 = vld [vmem:[#allocation2 + $0x138] sm:$0xff]  }
 0x341   :  { %4824 = vmatpush3.bf16.msra.mxu1 %v5226_v47  ;;  %4803 = vmatprep.subr.bf16.mxu0 %v5227_v63  ;;  %v5267_v47 = vld [vmem:[#allocation2 + $0x170] sm:$0xff]  }
 0x342   :  { %4825 = vmatprep.subr.bf16.mxu1 %v5228_v54  ;;  %v5268_v63 = vld [vmem:[#allocation2 + $0x1f0] sm:$0xff]   ;;  %v5272_v54 = vld [vmem:[#allocation2 + $0x1e8] sm:$0xff]  }
 0x344   :  { %4804 = vmatpush3.bf16.msra.mxu0 %v5229_v60  ;;  %v5275_v60 = vld [vmem:[#allocation2 + $0x160] sm:$0xff]  }
 0x345   :  { %4826 = vmatpush3.bf16.msra.mxu1 %v5230_v43  ;;  %4833 = vmatprep.subr.bf16.mxu0 %v5231_v45  ;;  %v5277_v43 = vld [vmem:[#allocation2 + $0x120] sm:$0xff]   ;;  %v5280_v45 = vld [vmem:[#allocation2 + $0x1d8] sm:$0xff]  }
 0x346   :  { %4855 = vmatprep.subr.bf16.mxu1 %v5232_v34  ;;  %v5281_v34 = vld [vmem:[#allocation2 + $0x118] sm:$0xff]  }
 0x347   :  { %2292 = vmatmul.mubr.bf16.vlgmr.msra.gmra.mxu0 %v1662_v42  ;;  %v5278_v42 = vld [vmem:[#allocation2 + $0x1a0] sm:$0xff]  }
 0x348   :  { %2332 = vmatmul.mubr.bf16.vlgmr.msra.gmra.mxu1 %v1664_v8  ;;  %4834 = vmatpush3.bf16.msra.mxu0 %v5233_v46  ;;  %v5279_v8 = vld [vmem:[#allocation2 + $0x158] sm:$0xff]   ;;  %v5283_v46 = vld [vmem:[#allocation2 + $0x150] sm:$0xff]  }
 0x349   :  { %4856 = vmatpush3.bf16.msra.mxu1 %v5234_v29  ;;  %2755 = vmatprep.mubr.bf16.mxu0 %v1485_v40  ;;  %v5282_v40 = vld [vmem:[#allocation2 + $0x198] sm:$0xff]   ;;  %v5285_v29 = vld [vmem:[#allocation2 + $0x110] sm:$0xff]  }
 0x34a   :  { %4835 = vmatprep.subr.bf16.mxu0 %v5235_v26  ;;  %2795 = vmatprep.mubr.bf16.mxu1 %v1487_v62  ;;  %v5284_v62 = vld [vmem:[#allocation2 + $0x1d0] sm:$0xff]  }
 0x34b   :  { %4857 = vmatprep.subr.bf16.mxu1 %v5236_v6  ;;  %v5286_v26 = vld [vmem:[#allocation2 + $0x190] sm:$0xff]   ;;  %v2900_v6 = vrot.slane %v6291_v56, 1 }
 0x34c   :  { %4836 = vmatpush3.bf16.msra.mxu0 %v5237_v55  ;;  %v5287_v55 = vld [vmem:[#allocation2 + $0x148] sm:$0xff]  }
 0x34d   :  { %4858 = vmatpush3.bf16.msra.mxu1 %v5238_v39  ;;  %4837 = vmatprep.subr.bf16.mxu0 %v5239_v49  ;;  %v5288_v39 = vld [vmem:[#allocation2 + $0x1c8] sm:$0xff]   ;;  %v2906_v49 = vrot.slane %v6291_v56, 7 }
 0x34e   :  { %4859 = vmatprep.subr.bf16.mxu1 %v5240_v38  ;;  %v5289_v38 = vld [vmem:[#allocation2 + $0x108] sm:$0xff]  }
 0x350   :  { %4838 = vmatpush3.bf16.msra.mxu0 %v5241_v21  ;;  %v2886_v21 = vrot.slane %v6289_v48, 1 }
 0x351   :  { %4860 = vmatpush3.bf16.msra.mxu1 %v5242_v15  ;;  %4839 = vmatprep.subr.bf16.mxu0 %v5243_v9  ;;  %v5290_v15 = vld [vmem:[#allocation2 + $0x188] sm:$0xff]   ;;  %v2908_v9 = vrot.slane %v2900_v6, 7 }
 0x352   :  { %4861 = vmatprep.subr.bf16.mxu1 %v5244_v30  ;;  %v5291_v30 = vld [vmem:[#allocation2 + $0x140] sm:$0xff]  }
 0x354   :  { %4840 = vmatpush3.bf16.msra.mxu0 %v5245_v28  ;;  %v5292_v28 = vld [vmem:[#allocation2 + $0x1c0] sm:$0xff]  }
 0x355   :  { %4862 = vmatpush3.bf16.msra.mxu1 %v5246_v23  ;;  %4841 = vmatprep.subr.bf16.mxu0 %v5247_v53  ;;  %v5293_v23 = vld [vmem:[#allocation2 + $0x100] sm:$0xff]   ;;  %v2922_v53 = vsel %vm394_vm4, %v6289_v48, %v2906_v49 }
 0x356   :  { %4863 = vmatprep.subr.bf16.mxu1 %v5248_v14  ;;  %v5294_v14 = vld [vmem:[#allocation2 + $0x180] sm:$0xff]  }
 0x358   :  { %4842 = vmatpush3.bf16.msra.mxu0 %v5249_v10  ;;  %v1488_v10 = vpack.c.bf16 %v6342_v25, %v6342_v25  ;;  %v5299_v25 = vld [vmem:[#allocation2 + $0x470] sm:$0xff]  }
 0x359   :  { %4864 = vmatpush3.bf16.msra.mxu1 %v5250_v5  ;;  %4843 = vmatprep.subr.bf16.mxu0 %v5251_v24  ;;  %v2924_v5 = vsel %vm394_vm4, %v2886_v21, %v2908_v9  ;;  %v1490_v24 = vpack.c.bf16 %v6347_v22, %v6347_v22  ;;  %v5302_v22 = vld [vmem:[#allocation2 + $0x4b0] sm:$0xff]  }
 0x35a   :  { %4865 = vmatprep.subr.bf16.mxu1 %v5252_v44  ;;  %v5295_v44 = vld [vmem:[#allocation2 + $0x478] sm:$0xff]   ;;  %v2932_v35 = vpack.c.bf16 %v2924_v5, %v2924_v5 }
 0x35b   :  { %v5330_v5 = vld [vmem:[#allocation2 + $0x5b8] sm:$0xff]  }
 0x35c   :  { %4844 = vmatpush3.bf16.msra.mxu0 %v5253_v4  ;;  %v5296_v4 = vld [vmem:[#allocation2 + $0x4f8] sm:$0xff]  }
 0x35d   :  { %4866 = vmatpush3.bf16.msra.mxu1 %v5254_v57  ;;  %4845 = vmatprep.subr.bf16.mxu0 %v5255_v61  ;;  %v2930_v57 = vpack.c.bf16 %v2922_v53, %v2922_v53  ;;  %v5297_v61 = vld [vmem:[#allocation2 + $0x438] sm:$0xff]  }
 0x35e   :  { %4867 = vmatprep.subr.bf16.mxu1 %v5256_v37  ;;  %v5298_v37 = vld [vmem:[#allocation2 + $0x4b8] sm:$0xff]  }
 0x360   :  { %4846 = vmatpush3.bf16.msra.mxu0 %v5257_v58  ;;  %v5300_v58 = vld [vmem:[#allocation2 + $0x4f0] sm:$0xff]  }
 0x361   :  { %4868 = vmatpush3.bf16.msra.mxu1 %v5258_v50  ;;  %4847 = vmatprep.subr.bf16.mxu0 %v5259_v51  ;;  %v5301_v50 = vld [vmem:[#allocation2 + $0x430] sm:$0xff]   ;;  %v5303_v51 = vld [vmem:[#allocation2 + $0x468] sm:$0xff]  }
 0x362   :  { %4869 = vmatprep.subr.bf16.mxu1 %v5260_v33  ;;  %v5305_v33 = vld [vmem:[#allocation2 + $0x428] sm:$0xff]  }
 0x364   :  { %4848 = vmatpush3.bf16.msra.mxu0 %v5261_v0  ;;  %v5306_v0 = vld [vmem:[#allocation2 + $0x4a8] sm:$0xff]  }
 0x365   :  { %4870 = vmatpush3.bf16.msra.mxu1 %v5262_v20  ;;  %4877 = vmatprep.subr.bf16.mxu0 %v5263_v19  ;;  %v5307_v20 = vld [vmem:[#allocation2 + $0x460] sm:$0xff]  }
 0x366   :  { %4899 = vmatprep.subr.bf16.mxu1 %v5264_v32  ;;  %v5310_v19 = vld [vmem:[#allocation2 + $0x4a0] sm:$0xff]   ;;  %v5311_v32 = vld [vmem:[#allocation2 + $0x458] sm:$0xff]  }
 0x367   :  { %2756 = vmatmul.mubr.bf16.vlgmr.msra.gmra.mxu0 %v1484_v17  ;;  %v5308_v17 = vld [vmem:[#allocation2 + $0x4e0] sm:$0xff]  }
 0x368   :  { %2796 = vmatmul.mubr.bf16.vlgmr.msra.gmra.mxu1 %v1486_v18  ;;  %4878 = vmatpush3.bf16.msra.mxu0 %v5265_v13  ;;  %v5309_v18 = vld [vmem:[#allocation2 + $0x420] sm:$0xff]   ;;  %v5313_v13 = vld [vmem:[#allocation2 + $0x418] sm:$0xff]  }
 0x369   :  { %4900 = vmatpush3.bf16.msra.mxu1 %v5266_v36  ;;  %2835 = vmatprep.mubr.bf16.mxu0 %v1489_v12  ;;  %v5312_v12 = vld [vmem:[#allocation2 + $0x4d8] sm:$0xff]  }
 0x36a   :  { %4879 = vmatprep.subr.bf16.mxu0 %v5267_v47  ;;  %2875 = vmatprep.mubr.bf16.mxu1 %v1491_v16  ;;  %v2899_v16 = vrot.slane %v6287_v31, 1  ;;  %v5314_v36 = vld [vmem:[#allocation2 + $0x498] sm:$0xff]   ;;  %v2905_v47 = vrot.slane %v6287_v31, 7 }
 0x36b   :  { %4901 = vmatprep.subr.bf16.mxu1 %v5268_v63  ;;  %v5315_v63 = vld [vmem:[#allocation2 + $0x450] sm:$0xff]  }
 0x36c   :  { %4880 = vmatpush3.bf16.msra.mxu0 %v5269_v7  ;;  %v2885_v7 = vrot.slane %v6285_v41, 1 }
 0x36d   :  { %4902 = vmatpush3.bf16.msra.mxu1 %v5270_v2  ;;  %4881 = vmatprep.subr.bf16.mxu0 %v5271_v1  ;;  %v5316_v2 = vld [vmem:[#allocation2 + $0x4d0] sm:$0xff]   ;;  %v2902_v1 = vrot.slane %v6291_v56, 2 }
 0x36e   :  { %4903 = vmatprep.subr.bf16.mxu1 %v5272_v54  ;;  %v5317_v54 = vld [vmem:[#allocation2 + $0x410] sm:$0xff]  }
 0x370   :  { %4882 = vmatpush3.bf16.msra.mxu0 %v5273_v27  ;;  %v2907_v27 = vrot.slane %v2899_v16, 7 }
 0x371   :  { %4904 = vmatpush3.bf16.msra.mxu1 %v5274_v59  ;;  %4883 = vmatprep.subr.bf16.mxu0 %v5275_v60  ;;  %v5318_v59 = vld [vmem:[#allocation2 + $0x490] sm:$0xff]   ;;  %v6410_v60 = vrot.slane %v6291_v56, 3  ;;  %v5389_v56 = vld [vmem:[#allocation2 + $0x600] sm:$0xff]  }
 0x372   :  { %4905 = vmatprep.subr.bf16.mxu1 %v5276_v52  ;;  %v5319_v52 = vld [vmem:[#allocation2 + $0x448] sm:$0xff]  }
 0x374   :  { %4884 = vmatpush3.bf16.msra.mxu0 %v5277_v43  ;;  %v2890_v43 = vrot.slane %v6289_v48, 2 }
 0x375   :  { %4906 = vmatpush3.bf16.msra.mxu1 %v5278_v42  ;;  %4885 = vmatprep.subr.bf16.mxu0 %v5279_v8  ;;  %v5320_v42 = vld [vmem:[#allocation2 + $0x4c8] sm:$0xff]   ;;  %v2910_v8 = vrot.slane %v2902_v1, 7 }
 0x376   :  { %4907 = vmatprep.subr.bf16.mxu1 %v5280_v45  ;;  %v5321_v45 = vld [vmem:[#allocation2 + $0x408] sm:$0xff]  }
 0x377   :  { %v2926_v49 = vsel %vm394_vm4, %v2890_v43, %v2910_v8  ;;  %v5354_v8 = vld [vmem:[#allocation2 + $0x588] sm:$0xff]  }
 0x378   :  { %4886 = vmatpush3.bf16.msra.mxu0 %v5281_v34  ;;  %v2894_v34 = vrot.slane %v6289_v48, 3  ;;  %v2934_v53 = vpack.c.bf16 %v2926_v49, %v2926_v49 }
 0x379   :  { %4908 = vmatpush3.bf16.msra.mxu1 %v5282_v40  ;;  %4887 = vmatprep.subr.bf16.mxu0 %v5283_v46  ;;  %v5322_v40 = vld [vmem:[#allocation2 + $0x488] sm:$0xff]   ;;  %v2912_v46 = vrot.slane %v6410_v60, 7 }
 0x37a   :  { %4909 = vmatprep.subr.bf16.mxu1 %v5284_v62  ;;  %v5323_v62 = vld [vmem:[#allocation2 + $0x440] sm:$0xff]  }
 0x37b   :  { %v2928_v9 = vsel %vm394_vm4, %v2894_v34, %v2912_v46 }
 0x37c   :  { %4888 = vmatpush3.bf16.msra.mxu0 %v5285_v29  ;;  %v2921_v29 = vsel %vm394_vm4, %v6285_v41, %v2905_v47  ;;  %v5350_v47 = vld [vmem:[#allocation2 + $0x590] sm:$0xff]  }
 0x37d   :  { %4910 = vmatpush3.bf16.msra.mxu1 %v5286_v26  ;;  %4889 = vmatprep.subr.bf16.mxu0 %v5287_v55  ;;  %v5324_v26 = vld [vmem:[#allocation2 + $0x4c0] sm:$0xff]   ;;  %v2923_v55 = vsel %vm394_vm4, %v2885_v7, %v2907_v27  ;;  %v5352_v27 = vld [vmem:[#allocation2 + $0x5c8] sm:$0xff]  }
 0x37e   :  { %4911 = vmatprep.subr.bf16.mxu1 %v5288_v39  ;;  %v5325_v39 = vld [vmem:[#allocation2 + $0x400] sm:$0xff]  }
 0x380   :  { %4890 = vmatpush3.bf16.msra.mxu0 %v5289_v38  ;;  %v5326_v38 = vld [vmem:[#allocation2 + $0x480] sm:$0xff]  }
 0x381   :  { %4912 = vmatpush3.bf16.msra.mxu1 %v5290_v15  ;;  %4891 = vmatprep.subr.bf16.mxu0 %v5291_v30  ;;  %v2929_v15 = vpack.c.bf16 %v2921_v29, %v2921_v29  ;;  %v2931_v30 = vpack.c.bf16 %v2923_v55, %v2923_v55  ;;  %v5358_v55 = vld [vmem:[#allocation2 + $0x580] sm:$0xff]  }
 0x382   :  { %4913 = vmatprep.subr.bf16.mxu1 %v5292_v28  ;;  %v5327_v28 = vld [vmem:[#allocation2 + $0x578] sm:$0xff]  }
 0x384   :  { %4892 = vmatpush3.bf16.msra.mxu0 %v5293_v23  ;;  %v5328_v23 = vld [vmem:[#allocation2 + $0x5f8] sm:$0xff]  }
 0x385   :  { %4914 = vmatpush3.bf16.msra.mxu1 %v5294_v14  ;;  %4921 = vmatprep.subr.bf16.mxu0 %v5295_v44  ;;  %v5329_v14 = vld [vmem:[#allocation2 + $0x538] sm:$0xff]   ;;  %v5332_v44 = vld [vmem:[#allocation2 + $0x5f0] sm:$0xff]  }
 0x386   :  { %4943 = vmatprep.subr.bf16.mxu1 %v5296_v4  ;;  %v5333_v4 = vld [vmem:[#allocation2 + $0x530] sm:$0xff]  }
 0x387   :  { %2836 = vmatmul.mubr.bf16.vlgmr.msra.gmra.mxu0 %v1488_v10  ;;  %v2936_v10 = vpack.c.bf16 %v2928_v9, %v2928_v9 }
 0x388   :  { %2876 = vmatmul.mubr.bf16.vlgmr.msra.gmra.mxu1 %v1490_v24  ;;  %4922 = vmatpush3.bf16.msra.mxu0 %v5297_v61  ;;  %v5331_v24 = vld [vmem:[#allocation2 + $0x570] sm:$0xff]   ;;  %v5335_v61 = vld [vmem:[#allocation2 + $0x568] sm:$0xff]  }
 0x389   :  { %4944 = vmatpush3.bf16.msra.mxu1 %v5298_v37  ;;  %3482 = vmatprep.mubr.bf16.mxu0 %v2930_v57  ;;  %v5334_v57 = vld [vmem:[#allocation2 + $0x5b0] sm:$0xff]   ;;  %v5337_v37 = vld [vmem:[#allocation2 + $0x528] sm:$0xff]  }
 0x38a   :  { %4923 = vmatprep.subr.bf16.mxu0 %v5299_v25  ;;  %3522 = vmatprep.mubr.bf16.mxu1 %v2932_v35  ;;  %v5336_v35 = vld [vmem:[#allocation2 + $0x5e8] sm:$0xff]  }
 0x38b   :  { %4945 = vmatprep.subr.bf16.mxu1 %v5300_v58  ;;  %v5338_v25 = vld [vmem:[#allocation2 + $0x5a8] sm:$0xff]   ;;  %v5339_v58 = vld [vmem:[#allocation2 + $0x560] sm:$0xff]  }
 0x38c   :  { %4924 = vmatpush3.bf16.msra.mxu0 %v5301_v50  ;;  %v5340_v50 = vld [vmem:[#allocation2 + $0x5e0] sm:$0xff]  }
 0x38d   :  { %4946 = vmatpush3.bf16.msra.mxu1 %v5302_v22  ;;  %4925 = vmatprep.subr.bf16.mxu0 %v5303_v51  ;;  %v5341_v22 = vld [vmem:[#allocation2 + $0x520] sm:$0xff]  }
 0x38e   :  { %4947 = vmatprep.subr.bf16.mxu1 %v5304_v3  ;;  %v5342_v51 = vld [vmem:[#allocation2 + $0x5a0] sm:$0xff]   ;;  %v5343_v3 = vld [vmem:[#allocation2 + $0x558] sm:$0xff]  }
 0x390   :  { %4926 = vmatpush3.bf16.msra.mxu0 %v5305_v33  ;;  %v5344_v33 = vld [vmem:[#allocation2 + $0x5d8] sm:$0xff]  }
 0x391   :  { %4948 = vmatpush3.bf16.msra.mxu1 %v5306_v0  ;;  %4927 = vmatprep.subr.bf16.mxu0 %v5307_v20  ;;  %v5345_v0 = vld [vmem:[#allocation2 + $0x518] sm:$0xff]  }
 0x392   :  { %4949 = vmatprep.subr.bf16.mxu1 %v5308_v17  ;;  %v5346_v20 = vld [vmem:[#allocation2 + $0x598] sm:$0xff]   ;;  %v2901_v17 = vrot.slane %v6287_v31, 2 }
 0x394   :  { %4928 = vmatpush3.bf16.msra.mxu0 %v5309_v18  ;;  %v5347_v18 = vld [vmem:[#allocation2 + $0x550] sm:$0xff]  }
 0x395   :  { %4950 = vmatpush3.bf16.msra.mxu1 %v5310_v19  ;;  %4929 = vmatprep.subr.bf16.mxu0 %v5311_v32  ;;  %v6430_v19 = vrot.slane %v6287_v31, 3  ;;  %v5348_v32 = vld [vmem:[#allocation2 + $0x5d0] sm:$0xff]   ;;  %v5420_v31 = vld [vmem:[#allocation2 + $0x7c0] sm:$0xff]  }
 0x396   :  { %4951 = vmatprep.subr.bf16.mxu1 %v5312_v12  ;;  %v2889_v12 = vrot.slane %v6285_v41, 2 }
 0x398   :  { %4930 = vmatpush3.bf16.msra.mxu0 %v5313_v13  ;;  %v5349_v13 = vld [vmem:[#allocation2 + $0x510] sm:$0xff]  }
 0x399   :  { %4952 = vmatpush3.bf16.msra.mxu1 %v5314_v36  ;;  %4931 = vmatprep.subr.bf16.mxu0 %v5315_v63  ;;  %v2893_v36 = vrot.slane %v6285_v41, 3  ;;  %v2909_v63 = vrot.slane %v2901_v17, 7 }
 0x39a   :  { %4953 = vmatprep.subr.bf16.mxu1 %v5316_v2  ;;  %v5351_v2 = vld [vmem:[#allocation2 + $0x548] sm:$0xff]  }
 0x39b   :  { %v2925_v46 = vsel %vm394_vm4, %v2889_v12, %v2909_v63  ;;  %v3616_v63 = vrot.slane %v2890_v43, 4  ;;  %v5388_v43 = vld [vmem:[#allocation2 + $0x6c0] sm:$0xff]  }
 0x39c   :  { %4932 = vmatpush3.bf16.msra.mxu0 %v5317_v54  ;;  %v2911_v54 = vrot.slane %v6430_v19, 7 }
 0x39d   :  { %4954 = vmatpush3.bf16.msra.mxu1 %v5318_v59  ;;  %4933 = vmatprep.subr.bf16.mxu0 %v5319_v52  ;;  %v3612_v59 = vrot.slane %v6289_v48, 4  ;;  %v5353_v52 = vld [vmem:[#allocation2 + $0x508] sm:$0xff]   ;;  %v5390_v48 = vld [vmem:[#allocation2 + $0x680] sm:$0xff]  }
 0x39e   :  { %4955 = vmatprep.subr.bf16.mxu1 %v5320_v42  ;;  %v3614_v42 = vrot.slane %v2886_v21, 4  ;;  %v2927_v29 = vsel %vm394_vm4, %v2893_v36, %v2911_v54  ;;  %v3630_v54 = vrot.slane %v2902_v1, 3 }
 0x39f   :  { %v3642_v21 = vsel %vm394_vm4, %v3612_v59, %v6410_v60  ;;  %v2935_v49 = vpack.c.bf16 %v2927_v29, %v2927_v29  ;;  %v5386_v59 = vld [vmem:[#allocation2 + $0x688] sm:$0xff]   ;;  %v5393_v29 = vld [vmem:[#allocation2 + $0x738] sm:$0xff]  }
 0x3a0   :  { %4934 = vmatpush3.bf16.msra.mxu0 %v5321_v45  ;;  %v3628_v45 = vrot.slane %v2900_v6, 3  ;;  %v2933_v6 = vpack.c.bf16 %v2925_v46, %v2925_v46  ;;  %v3650_v9 = vpack.c.bf16 %v3642_v21, %v3642_v21  ;;  %v3646_v1 = vsel %vm394_vm4, %v3616_v63, %v3630_v54  ;;  %v5392_v46 = vld [vmem:[#allocation2 + $0x7f8] sm:$0xff]  }
 0x3a1   :  { %4956 = vmatpush3.bf16.msra.mxu1 %v5322_v40  ;;  %4935 = vmatprep.subr.bf16.mxu0 %v5323_v62  ;;  %v5355_v40 = vld [vmem:[#allocation2 + $0x540] sm:$0xff]   ;;  %v3617_v63 = vrot.slane %v2893_v36, 4  ;;  %v3631_v54 = vrot.slane %v6430_v19, 3 }
 0x3a2   :  { %4957 = vmatprep.subr.bf16.mxu1 %v5324_v26  ;;  %v5356_v62 = vld [vmem:[#allocation2 + $0x5c0] sm:$0xff]  }
 0x3a3   :  { %v5357_v26 = vld [vmem:[#allocation2 + $0x500] sm:$0xff]  }
 0x3a4   :  { %4936 = vmatpush3.bf16.msra.mxu0 %v5325_v39  ;;  %v3644_v39 = vsel %vm394_vm4, %v3614_v42, %v3628_v45 }
 0x3a5   :  { %4958 = vmatpush3.bf16.msra.mxu1 %v5326_v38  ;;  %4965 = vmatprep.subr.bf16.mxu0 %v5327_v28  ;;  %v5359_v38 = vld [vmem:[#allocation2 + $0x678] sm:$0xff]   ;;  %v3652_v28 = vpack.c.bf16 %v3644_v39, %v3644_v39  ;;  %v5395_v39 = vld [vmem:[#allocation2 + $0x770] sm:$0xff]  }
 0x3a6   :  { %4987 = vmatprep.subr.bf16.mxu1 %v5328_v23  ;;  %v5362_v23 = vld [vmem:[#allocation2 + $0x6b8] sm:$0xff]  }
 0x3a7   :  { %3483 = vmatmul.mubr.bf16.vlgmr.msra.gmra.mxu0 %v2929_v15  ;;  %v5360_v15 = vld [vmem:[#allocation2 + $0x6f8] sm:$0xff]  }
 0x3a8   :  { %3523 = vmatmul.mubr.bf16.vlgmr.msra.gmra.mxu1 %v2931_v30  ;;  %4966 = vmatpush3.bf16.msra.mxu0 %v5329_v14  ;;  %v5361_v30 = vld [vmem:[#allocation2 + $0x638] sm:$0xff]   ;;  %v5364_v14 = vld [vmem:[#allocation2 + $0x6f0] sm:$0xff]  }
 0x3a9   :  { %4988 = vmatpush3.bf16.msra.mxu1 %v5330_v5  ;;  %3562 = vmatprep.mubr.bf16.mxu0 %v2934_v53  ;;  %v5363_v53 = vld [vmem:[#allocation2 + $0x670] sm:$0xff]  }
 0x3aa   :  { %4967 = vmatprep.subr.bf16.mxu0 %v5331_v24  ;;  %3602 = vmatprep.mubr.bf16.mxu1 %v2936_v10  ;;  %v5365_v10 = vld [vmem:[#allocation2 + $0x630] sm:$0xff]   ;;  %v5367_v24 = vld [vmem:[#allocation2 + $0x668] sm:$0xff]  }
 0x3ab   :  { %4989 = vmatprep.subr.bf16.mxu1 %v5332_v44  ;;  %v5366_v5 = vld [vmem:[#allocation2 + $0x6b0] sm:$0xff]   ;;  %v5368_v44 = vld [vmem:[#allocation2 + $0x6e8] sm:$0xff]  }
 0x3ac   :  { %4968 = vmatpush3.bf16.msra.mxu0 %v5333_v4  ;;  %v5369_v4 = vld [vmem:[#allocation2 + $0x628] sm:$0xff]  }
 0x3ad   :  { %4990 = vmatpush3.bf16.msra.mxu1 %v5334_v57  ;;  %4969 = vmatprep.subr.bf16.mxu0 %v5335_v61  ;;  %v5370_v57 = vld [vmem:[#allocation2 + $0x6a8] sm:$0xff]   ;;  %v5371_v61 = vld [vmem:[#allocation2 + $0x660] sm:$0xff]  }
 0x3ae   :  { %4991 = vmatprep.subr.bf16.mxu1 %v5336_v35  ;;  %v5372_v35 = vld [vmem:[#allocation2 + $0x6e0] sm:$0xff]  }
 0x3b0   :  { %4970 = vmatpush3.bf16.msra.mxu0 %v5337_v37  ;;  %v5373_v37 = vld [vmem:[#allocation2 + $0x620] sm:$0xff]  }
 0x3b1   :  { %4992 = vmatpush3.bf16.msra.mxu1 %v5338_v25  ;;  %4971 = vmatprep.subr.bf16.mxu0 %v5339_v58  ;;  %v5374_v25 = vld [vmem:[#allocation2 + $0x6a0] sm:$0xff]   ;;  %v5375_v58 = vld [vmem:[#allocation2 + $0x658] sm:$0xff]  }
 0x3b2   :  { %4993 = vmatprep.subr.bf16.mxu1 %v5340_v50  ;;  %v5376_v50 = vld [vmem:[#allocation2 + $0x6d8] sm:$0xff]  }
 0x3b4   :  { %4972 = vmatpush3.bf16.msra.mxu0 %v5341_v22  ;;  %v5377_v22 = vld [vmem:[#allocation2 + $0x618] sm:$0xff]  }
 0x3b5   :  { %4994 = vmatpush3.bf16.msra.mxu1 %v5342_v51  ;;  %4973 = vmatprep.subr.bf16.mxu0 %v5343_v3  ;;  %v5378_v51 = vld [vmem:[#allocation2 + $0x698] sm:$0xff]   ;;  %v5379_v3 = vld [vmem:[#allocation2 + $0x650] sm:$0xff]  }
 0x3b6   :  { %4995 = vmatprep.subr.bf16.mxu1 %v5344_v33  ;;  %v5380_v33 = vld [vmem:[#allocation2 + $0x6d0] sm:$0xff]  }
 0x3b8   :  { %4974 = vmatpush3.bf16.msra.mxu0 %v5345_v0  ;;  %v3611_v0 = vrot.slane %v6285_v41, 4  ;;  %v5422_v41 = vld [vmem:[#allocation2 + $0x780] sm:$0xff]  }
 0x3b9   :  { %4996 = vmatpush3.bf16.msra.mxu1 %v5346_v20  ;;  %4975 = vmatprep.subr.bf16.mxu0 %v5347_v18  ;;  %v5381_v20 = vld [vmem:[#allocation2 + $0x610] sm:$0xff]   ;;  %v3613_v18 = vrot.slane %v2885_v7, 4  ;;  %v3618_v7 = vrot.slane %v2894_v34, 4 }
 0x3ba   :  { %4997 = vmatprep.subr.bf16.mxu1 %v5348_v32  ;;  %v5382_v32 = vld [vmem:[#allocation2 + $0x690] sm:$0xff]   ;;  %v3641_v42 = vsel %vm394_vm4, %v3611_v0, %v6430_v19 }
 0x3bb   :  { %v3649_v34 = vpack.c.bf16 %v3641_v42, %v3641_v42  ;;  %v5412_v0 = vld [vmem:[#allocation2 + $0x7d0] sm:$0xff]  }
 0x3bc   :  { %4976 = vmatpush3.bf16.msra.mxu0 %v5349_v13  ;;  %v3627_v13 = vrot.slane %v2899_v16, 3  ;;  %v5387_v16 = vld [vmem:[#allocation2 + $0x640] sm:$0xff]  }
 0x3bd   :  { %4998 = vmatpush3.bf16.msra.mxu1 %v5350_v47  ;;  %4977 = vmatprep.subr.bf16.mxu0 %v5351_v2  ;;  %v5383_v47 = vld [vmem:[#allocation2 + $0x648] sm:$0xff]  }
 0x3be   :  { %4999 = vmatprep.subr.bf16.mxu1 %v5352_v27  ;;  %v5384_v2 = vld [vmem:[#allocation2 + $0x6c8] sm:$0xff]  }
 0x3bf   :  { %v5385_v27 = vld [vmem:[#allocation2 + $0x608] sm:$0xff]  }
 0x3c0   :  { %4978 = vmatpush3.bf16.msra.mxu0 %v5353_v52  ;;  %v3632_v52 = vrot.slane %v6410_v60, 3 }
 0x3c1   :  { %5000 = vmatpush3.bf16.msra.mxu1 %v5354_v8  ;;  %4979 = vmatprep.subr.bf16.mxu0 %v5355_v40  ;;  %v3643_v8 = vsel %vm394_vm4, %v3613_v18, %v3627_v13  ;;  %v5391_v40 = vld [vmem:[#allocation2 + $0x778] sm:$0xff]   ;;  %v3615_v18 = vrot.slane %v2889_v12, 4  ;;  %v3629_v13 = vrot.slane %v2901_v17, 3  ;;  %v5419_v12 = vld [vmem:[#allocation2 + $0x740] sm:$0xff]   ;;  %v3647_v17 = vsel %vm394_vm4, %v3617_v63, %v3631_v54  ;;  %v4349_v63 = vld [vmem:[%s6568_s11 + $0x8] sm:$0xff] }
 0x3c2   :  { %5001 = vmatprep.subr.bf16.mxu1 %v5356_v62  ;;  %v3648_v45 = vsel %vm394_vm4, %v3618_v7, %v3632_v52  ;;  %v3651_v60 = vpack.c.bf16 %v3643_v8, %v3643_v8  ;;  %v3654_v62 = vpack.c.bf16 %v3646_v1, %v3646_v1  ;;  %v5418_v7 = vld [vmem:[#allocation2 + $0x788] sm:$0xff]   ;;  %v5421_v52 = vld [vmem:[#allocation2 + $0x700] sm:$0xff]  }
 0x3c4   :  { %4980 = vmatpush3.bf16.msra.mxu0 %v5357_v26  ;;  %v3656_v26 = vpack.c.bf16 %v3648_v45, %v3648_v45 }
 0x3c5   :  { %5002 = vmatpush3.bf16.msra.mxu1 %v5358_v55  ;;  %5009 = vmatprep.subr.bf16.mxu0 %v5359_v38  ;;  %v5394_v55 = vld [vmem:[#allocation2 + $0x7b8] sm:$0xff]   ;;  %v5396_v38 = vld [vmem:[#allocation2 + $0x7f0] sm:$0xff]  }
 0x3c6   :  { %5031 = vmatprep.subr.bf16.mxu1 %v5360_v15 }
 0x3c7   :  { %3563 = vmatmul.mubr.bf16.vlgmr.msra.gmra.mxu0 %v2933_v6 }
 0x3c8   :  { %3603 = vmatmul.mubr.bf16.vlgmr.msra.gmra.mxu1 %v2935_v49  ;;  %5010 = vmatpush3.bf16.msra.mxu0 %v5361_v30  ;;  %v5397_v30 = vld [vmem:[#allocation2 + $0x730] sm:$0xff]  }
 0x3c9   :  { %5032 = vmatpush3.bf16.msra.mxu1 %v5362_v23  ;;  %4202 = vmatprep.mubr.bf16.mxu0 %v3650_v9 }
 0x3ca   :  { %5011 = vmatprep.subr.bf16.mxu0 %v5363_v53  ;;  %4242 = vmatprep.mubr.bf16.mxu1 %v3652_v28  ;;  %v5398_v53 = vld [vmem:[#allocation2 + $0x7b0] sm:$0xff]  }
 0x3cb   :  { %5033 = vmatprep.subr.bf16.mxu1 %v5364_v14 }
 0x3cc   :  { %5012 = vmatpush3.bf16.msra.mxu0 %v5365_v10  ;;  %v5399_v10 = vld [vmem:[#allocation2 + $0x768] sm:$0xff]  }
 0x3cd   :  { %5034 = vmatpush3.bf16.msra.mxu1 %v5366_v5  ;;  %5013 = vmatprep.subr.bf16.mxu0 %v5367_v24 }
 0x3ce   :  { %5035 = vmatprep.subr.bf16.mxu1 %v5368_v44  ;;  %v5400_v44 = vld [vmem:[#allocation2 + $0x7e8] sm:$0xff]  }
 0x3d0   :  { %5014 = vmatpush3.bf16.msra.mxu0 %v5369_v4 }
 0x3d1   :  { %5036 = vmatpush3.bf16.msra.mxu1 %v5370_v57  ;;  %5015 = vmatprep.subr.bf16.mxu0 %v5371_v61  ;;  %v5401_v57 = vld [vmem:[#allocation2 + $0x728] sm:$0xff]  }
 0x3d2   :  { %5037 = vmatprep.subr.bf16.mxu1 %v5372_v35  ;;  %v5402_v61 = vld [vmem:[#allocation2 + $0x7a8] sm:$0xff]   ;;  %v5403_v35 = vld [vmem:[#allocation2 + $0x760] sm:$0xff]  }
 0x3d4   :  { %5016 = vmatpush3.bf16.msra.mxu0 %v5373_v37  ;;  %v5404_v37 = vld [vmem:[#allocation2 + $0x7e0] sm:$0xff]  }
 0x3d5   :  { %5038 = vmatpush3.bf16.msra.mxu1 %v5374_v25  ;;  %5017 = vmatprep.subr.bf16.mxu0 %v5375_v58  ;;  %v5405_v25 = vld [vmem:[#allocation2 + $0x720] sm:$0xff]  }
 0x3d6   :  { %5039 = vmatprep.subr.bf16.mxu1 %v5376_v50  ;;  %v5406_v58 = vld [vmem:[#allocation2 + $0x7a0] sm:$0xff]   ;;  %v5407_v50 = vld [vmem:[#allocation2 + $0x758] sm:$0xff]  }
 0x3d8   :  { %5018 = vmatpush3.bf16.msra.mxu0 %v5377_v22  ;;  %v5408_v22 = vld [vmem:[#allocation2 + $0x7d8] sm:$0xff]  }
 0x3d9   :  { %5040 = vmatpush3.bf16.msra.mxu1 %v5378_v51  ;;  %5019 = vmatprep.subr.bf16.mxu0 %v5379_v3  ;;  %v5409_v51 = vld [vmem:[#allocation2 + $0x718] sm:$0xff]  }
 0x3da   :  { %5041 = vmatprep.subr.bf16.mxu1 %v5380_v33  ;;  %v5410_v3 = vld [vmem:[#allocation2 + $0x798] sm:$0xff]   ;;  %v5411_v33 = vld [vmem:[#allocation2 + $0x750] sm:$0xff]  }
 0x3dc   :  { %5020 = vmatpush3.bf16.msra.mxu0 %v5381_v20  ;;  %v5413_v20 = vld [vmem:[#allocation2 + $0x710] sm:$0xff]  }
 0x3dd   :  { %5042 = vmatpush3.bf16.msra.mxu1 %v5382_v32  ;;  %5021 = vmatprep.subr.bf16.mxu0 %v5383_v47  ;;  %v5414_v32 = vld [vmem:[#allocation2 + $0x790] sm:$0xff]   ;;  %v5415_v47 = vld [vmem:[#allocation2 + $0x748] sm:$0xff]  }
 0x3de   :  { %5043 = vmatprep.subr.bf16.mxu1 %v5384_v2  ;;  %v5416_v2 = vld [vmem:[#allocation2 + $0x7c8] sm:$0xff]  }
 0x3e0   :  { %5022 = vmatpush3.bf16.msra.mxu0 %v5385_v27  ;;  %v5417_v27 = vld [vmem:[#allocation2 + $0x708] sm:$0xff]  }
 0x3e1   :  { %5044 = vmatpush3.bf16.msra.mxu1 %v5386_v59  ;;  %5023 = vmatprep.subr.bf16.mxu0 %v5387_v16  ;;  %v3645_v59 = vsel %vm394_vm4, %v3615_v18, %v3629_v13  ;;  %v3655_v16 = vpack.c.bf16 %v3647_v17, %v3647_v17  ;;  %v4351_v13 = vld [vmem:[%s6568_s11 + $0x18] sm:$0xff] }
 0x3e2   :  { %5045 = vmatprep.subr.bf16.mxu1 %v5388_v43  ;;  %v3653_v36 = vpack.c.bf16 %v3645_v59, %v3645_v59 }
 0x3e4   :  { %5024 = vmatpush3.bf16.msra.mxu0 %v5389_v56 }
 0x3e5   :  { %5046 = vmatpush3.bf16.msra.mxu1 %v5390_v48  ;;  %5053 = vmatprep.subr.bf16.mxu0 %v5391_v40 }
 0x3e6   :  { %5075 = vmatprep.subr.bf16.mxu1 %v5392_v46 }
 0x3e7   :  { %v4761_v21 = vpop.f32.mrf.mxu0  ;;  %4203 = vmatmul.mubr.bf16.vlgmr.msra.gmra.mxu0 %v3649_v34 }
 0x3e8   :  { %v4783_v6 = vpop.f32.mrf.mxu1  ;;  %4243 = vmatmul.mubr.bf16.vlgmr.msra.gmra.mxu1 %v3651_v60  ;;  %5054 = vmatpush3.bf16.msra.mxu0 %v5393_v29 }
 0x3e9   :  { %5076 = vmatpush3.bf16.msra.mxu1 %v5394_v55  ;;  %v4762_v49 = vpop.f32.mrf.mxu0  ;;  %4282 = vmatprep.mubr.bf16.mxu0 %v3654_v62 }
 0x3ea   :  { %v4763_v15 = vadd.f32 %v4762_v49, %v4761_v21  ;;  %v4784_v9 = vpop.f32.mrf.mxu1  ;;  %5055 = vmatprep.subr.bf16.mxu0 %v5395_v39  ;;  %4322 = vmatprep.mubr.bf16.mxu1 %v3656_v26 }
 0x3eb   :  { %v4785_v28 = vadd.f32 %v4784_v9, %v4783_v6  ;;  %v4764_v23 = vpop.f32.mrf.mxu0  ;;  %5077 = vmatprep.subr.bf16.mxu1 %v5396_v38 }
 0x3ec   :  { %v4786_v14 = vpop.f32.mrf.mxu1  ;;  %5056 = vmatpush3.bf16.msra.mxu0 %v5397_v30  ;;  %v4362_v23 = vld [vmem:[%s6568_s11 + $0x70] sm:$0xff] }
 0x3ed   :  { %v6468_v5 = vadd.f32 %v4785_v28, %v4763_v15  ;;  %5078 = vmatpush3.bf16.msra.mxu1 %v5398_v53  ;;  %v4765_v24 = vpop.f32.mrf.mxu0  ;;  %5057 = vmatprep.subr.bf16.mxu0 %v5399_v10  ;;  %v4363_v28 = vld [vmem:[%s6568_s11 + $0x78] sm:$0xff]  ;;  %v4361_v53 = vld [vmem:[%s6568_s11 + $0x68] sm:$0xff]  ;;  %v4360_v14 = vld [vmem:[%s6568_s11 + $0x60] sm:$0xff] }
 0x3ee   :  { %v4787_v4 = vpop.f32.mrf.mxu1  ;;  %5079 = vmatprep.subr.bf16.mxu1 %v5400_v44  ;;  %v4359_v10 = vld [vmem:[%s6568_s11 + $0x58] sm:$0xff]  ;;  %v4357_v24 = vld [vmem:[%s6568_s11 + $0x48] sm:$0xff] }
 0x3ef   :  { %v4356_v4 = vld [vmem:[%s6568_s11 + $0x40] sm:$0xff] }
 0x3f0   :  { %5058 = vmatpush3.bf16.msra.mxu0 %v5401_v57 }
 0x3f1   :  { %5080 = vmatpush3.bf16.msra.mxu1 %v5402_v61  ;;  %5059 = vmatprep.subr.bf16.mxu0 %v5403_v35  ;;  %v4355_v35 = vld [vmem:[%s6568_s11 + $0x38] sm:$0xff] }
 0x3f2   :  { %5081 = vmatprep.subr.bf16.mxu1 %v5404_v37 }
 0x3f4   :  { %5060 = vmatpush3.bf16.msra.mxu0 %v5405_v25 }
 0x3f5   :  { %5082 = vmatpush3.bf16.msra.mxu1 %v5406_v58  ;;  %5061 = vmatprep.subr.bf16.mxu0 %v5407_v50 }
 0x3f6   :  { %5083 = vmatprep.subr.bf16.mxu1 %v5408_v22  ;;  %v4354_v22 = vld [vmem:[%s6568_s11 + $0x30] sm:$0xff] }
 0x3f8   :  { %5062 = vmatpush3.bf16.msra.mxu0 %v5409_v51 }
 0x3f9   :  { %5084 = vmatpush3.bf16.msra.mxu1 %v5410_v3  ;;  %5063 = vmatprep.subr.bf16.mxu0 %v5411_v33 }
 0x3fa   :  { %5085 = vmatprep.subr.bf16.mxu1 %v5412_v0  ;;  %v4353_v0 = vld [vmem:[%s6568_s11 + $0x28] sm:$0xff] }
 0x3fc   :  { %5064 = vmatpush3.bf16.msra.mxu0 %v5413_v20 }
 0x3fd   :  { %5086 = vmatpush3.bf16.msra.mxu1 %v5414_v32  ;;  %5065 = vmatprep.subr.bf16.mxu0 %v5415_v47  ;;  %v4352_v32 = vld [vmem:[%s6568_s11 + $0x20] sm:$0xff]  ;;  %v4350_v47 = vld [vmem:[%s6568_s11 + $0x10] sm:$0xff] }
 0x3fe   :  { %5087 = vmatprep.subr.bf16.mxu1 %v5416_v2  ;;  %v4348_v2 = vld [vmem:[%s6568_s11] sm:$0xff] }
 0x400   :  { %5066 = vmatpush3.bf16.msra.mxu0 %v5417_v27 }
 0x401   :  { %5088 = vmatpush3.bf16.msra.mxu1 %v5418_v7  ;;  %5067 = vmatprep.subr.bf16.mxu0 %v5419_v12 }
 0x402   :  { %5089 = vmatprep.subr.bf16.mxu1 %v5420_v31 }
 0x404   :  { %5068 = vmatpush3.bf16.msra.mxu0 %v5421_v52 }
 0x405   :  { %5090 = vmatpush3.bf16.msra.mxu1 %v5422_v41  ;;  %5114 = vmatprep.subr.mxu0 %v5475_v11 }
 0x407   :  { %v4805_v19 = vpop.f32.mrf.mxu0  ;;  %4283 = vmatmul.mubr.bf16.vlgmr.msra.gmra.mxu0 %v3653_v36 }
 0x408   :  { %v4827_v42 = vpop.f32.mrf.mxu1  ;;  %4323 = vmatmul.mubr.bf16.vlgmr.msra.gmra.mxu1 %v3655_v16  ;;  %5115 = vmatpush3.msra.mxu0 %v4363_v28 }
 0x409   :  { %v4806_v43 = vpop.f32.mrf.mxu0  ;;  %5116 = vmatprep.subr.mxu0 %v5475_v11  ;;  %5146 = vmatprep.mubr.msk.f32.mxu0 %vm5479_vm0, %v5475_v11 }
 0x40a   :  { %v4807_v8 = vadd.f32 %v4806_v43, %v4805_v19  ;;  %v4828_v56 = vpop.f32.mrf.mxu1  ;;  %5117 = vmatpush3.msra.mxu0 %v4362_v23 }
 0x40b   :  { %v4829_v1 = vadd.f32 %v4828_v56, %v4827_v42  ;;  %v4808_v48 = vpop.f32.mrf.mxu0  ;;  %5118 = vmatprep.subr.mxu0 %v5475_v11 }
 0x40c   :  { %v2294_v34 = vadd.f32 %v4807_v8, %v6468_v5  ;;  %v4830_v45 = vpop.f32.mrf.mxu1  ;;  %5119 = vmatpush3.msra.mxu0 %v4361_v53  ;;  %v4358_v5 = vld [vmem:[%s6568_s11 + $0x50] sm:$0xff] }
 0x40d   :  { %v4809_v60 = vpop.f32.mrf.mxu0  ;;  %5120 = vmatprep.subr.mxu0 %v5475_v11 }
 0x40e   :  { %v2334_v40 = vadd.f32 %v4829_v1, %v2294_v34  ;;  %v4831_v46 = vpop.f32.mrf.mxu1  ;;  %5121 = vmatpush3.msra.mxu0 %v4360_v14 }
 0x40f   :  { %5122 = vmatprep.subr.mxu0 %v5475_v11 }
 0x410   :  { %5123 = vmatpush3.msra.mxu0 %v4359_v10 }
 0x411   :  { %5124 = vmatprep.subr.mxu0 %v5475_v11 }
 0x412   :  { %5125 = vmatpush3.msra.mxu0 %v4358_v5 }
 0x413   :  { %5126 = vmatprep.subr.mxu0 %v5475_v11 }
 0x414   :  { %5127 = vmatpush3.msra.mxu0 %v4357_v24 }
 0x415   :  { %5128 = vmatprep.subr.mxu0 %v5475_v11 }
 0x416   :  { %5129 = vmatpush3.msra.mxu0 %v4356_v4 }
 0x417   :  { %5130 = vmatprep.subr.mxu0 %v5475_v11 }
 0x418   :  { %5131 = vmatpush3.msra.mxu0 %v4355_v35  ;;  %v4741_v35 = vld [vmem:[%s6566_s9] ss:$0 sm:$0xff]  ;;  %s5443_s9 = scalar_lea.vmem %s4450_s16, 32 }
 0x419   :  { %5132 = vmatprep.subr.mxu0 %v5475_v11  ;;  %p5444_p5 = scmp.ne.s32.totalorder %s4450_s16, %s5443_s9  ;;  %p5449_p7 = scmp.lt.s32.totalorder %s5443_s9, %s5443_s9 }
 0x41a   :  { %5133 = vmatpush3.msra.mxu0 %v4354_v22 }
 0x41b   :  { %5134 = vmatprep.subr.mxu0 %v5475_v11  ;;  %p5450_p8 = por %p5449_p7, %p5448_p6 }
 0x41c   :  { %5135 = vmatpush3.msra.mxu0 %v4353_v0 }
 0x41d   :  { %5136 = vmatprep.subr.mxu0 %v5475_v11  ;;  %p5451_p9 = pnand %p5450_p8, %p5444_p5 }
 0x41e   :  { %5137 = vmatpush3.msra.mxu0 %v4352_v32 }
 0x41f   :  { %5138 = vmatprep.subr.mxu0 %v5475_v11 }
 0x420   :  { %5139 = vmatpush3.msra.mxu0 %v4351_v13 }
 0x421   :  { %5140 = vmatprep.subr.mxu0 %v5475_v11 }
 0x422   :  { %5141 = vmatpush3.msra.mxu0 %v4350_v47 }
 0x423   :  { %5142 = vmatprep.subr.mxu0 %v5475_v11 }
 0x424   :  { %5143 = vmatpush3.msra.mxu0 %v4349_v63 }
 0x425   :  { %5144 = vmatprep.subr.mxu0 %v5475_v11 }
 0x426   :  { %5145 = vmatpush3.msra.mxu0 %v4348_v2 }
 0x427   :  { %v4849_v62 = vpop.f32.mrf.mxu0 }
 0x428   :  { %v4871_v29 = vpop.f32.mrf.mxu1 }
 0x429   :  { %v4850_v26 = vpop.f32.mrf.mxu0 }
 0x42a   :  { %v4851_v21 = vadd.f32 %v4850_v26, %v4849_v62  ;;  %v4872_v55 = vpop.f32.mrf.mxu1 }
 0x42b   :  { %v4873_v6 = vadd.f32 %v4872_v55, %v4871_v29  ;;  %v4852_v39 = vpop.f32.mrf.mxu0 }
 0x42c   :  { %v2758_v49 = vadd.f32 %v4851_v21, %v2334_v40  ;;  %v4874_v38 = vpop.f32.mrf.mxu1 }
 0x42d   :  { %v4853_v15 = vpop.f32.mrf.mxu0 }
 0x42e   :  { %v2798_v9 = vadd.f32 %v4873_v6, %v2758_v49  ;;  %v4875_v30 = vpop.f32.mrf.mxu1 }
 0x447   :  { %v4893_v44 = vpop.f32.mrf.mxu0 }
 0x448   :  { %v4915_v57 = vpop.f32.mrf.mxu1 }
 0x449   :  { %v4894_v61 = vpop.f32.mrf.mxu0 }
 0x44a   :  { %v4895_v37 = vadd.f32 %v4894_v61, %v4893_v44  ;;  %v4916_v25 = vpop.f32.mrf.mxu1 }
 0x44b   :  { %v4917_v58 = vadd.f32 %v4916_v25, %v4915_v57  ;;  %v4896_v50 = vpop.f32.mrf.mxu0  ;;  %v4742_v25 = vld [vmem:[%s6567_s10] ss:$0 sm:$0xff] }
 0x44c   :  { %v2838_v51 = vadd.f32 %v4895_v37, %v2798_v9  ;;  %v4918_v3 = vpop.f32.mrf.mxu1 }
 0x44d   :  { %v4897_v33 = vpop.f32.mrf.mxu0 }
 0x44e   :  { %v2878_v20 = vadd.f32 %v4917_v58, %v2838_v51  ;;  %v4919_v18 = vpop.f32.mrf.mxu1  ;;  %v4743_v51 = vld [vmem:[%s6569_s12] ss:$0 sm:$0xff] }
 0x467   :  { %v4937_v54 = vpop.f32.mrf.mxu0 }
 0x468   :  { %v4959_v27 = vpop.f32.mrf.mxu1 }
 0x469   :  { %v4938_v7 = vpop.f32.mrf.mxu0 }
 0x46a   :  { %v4939_v12 = vadd.f32 %v4938_v7, %v4937_v54  ;;  %v4960_v59 = vpop.f32.mrf.mxu1 }
 0x46b   :  { %v4961_v31 = vadd.f32 %v4960_v59, %v4959_v27  ;;  %v4940_v17 = vpop.f32.mrf.mxu0 }
 0x46c   :  { %v4962_v52 = vpop.f32.mrf.mxu1 }
 0x46d   :  { %v3525_v41 = vadd.f32 %v4961_v31, %v4939_v12  ;;  %v4941_v36 = vpop.f32.mrf.mxu0 }
 0x46e   :  { %v4963_v16 = vpop.f32.mrf.mxu1 }
 0x487   :  { %v4981_v19 = vpop.f32.mrf.mxu0 }
 0x488   :  { %v5003_v42 = vpop.f32.mrf.mxu1 }
 0x489   :  { %v4982_v43 = vpop.f32.mrf.mxu0 }
 0x48a   :  { %v4983_v8 = vadd.f32 %v4982_v43, %v4981_v19  ;;  %v5004_v56 = vpop.f32.mrf.mxu1 }
 0x48b   :  { %v5005_v1 = vadd.f32 %v5004_v56, %v5003_v42  ;;  %v4984_v48 = vpop.f32.mrf.mxu0 }
 0x48c   :  { %v3565_v11 = vadd.f32 %v4983_v8, %v3525_v41  ;;  %v5006_v34 = vpop.f32.mrf.mxu1 }
 0x48d   :  { %v4985_v45 = vpop.f32.mrf.mxu0 }
 0x48e   :  { %v3605_v60 = vadd.f32 %v5005_v1, %v3565_v11  ;;  %v5007_v40 = vpop.f32.mrf.mxu1 }
 0x490   :  { %v3610_v46 = vadd.f32 %v3605_v60, %v2878_v20 }
 0x4a7   :  { %v5025_v62 = vpop.f32.mrf.mxu0 }
 0x4a8   :  { %v5047_v29 = vpop.f32.mrf.mxu1 }
 0x4a9   :  { %v5026_v26 = vpop.f32.mrf.mxu0 }
 0x4aa   :  { %v5048_v21 = vpop.f32.mrf.mxu1  ;;  %v5027_v38 = vadd.f32 %v5026_v26, %v5025_v62 }
 0x4ab   :  { %v5028_v55 = vpop.f32.mrf.mxu0  ;;  %v5049_v15 = vadd.f32 %v5048_v21, %v5047_v29 }
 0x4ac   :  { %v5050_v6 = vpop.f32.mrf.mxu1 }
 0x4ad   :  { %v5029_v39 = vpop.f32.mrf.mxu0  ;;  %v4245_v23 = vadd.f32 %v5049_v15, %v5027_v38 }
 0x4ae   :  { %v5051_v49 = vpop.f32.mrf.mxu1 }
 0x4c7   :  { %v5069_v9 = vpop.f32.mrf.mxu0 }
 0x4c8   :  { %v5091_v30 = vpop.f32.mrf.mxu1 }
 0x4c9   :  { %v5070_v28 = vpop.f32.mrf.mxu0 }
 0x4ca   :  { %v5071_v53 = vadd.f32 %v5070_v28, %v5069_v9  ;;  %v5092_v14 = vpop.f32.mrf.mxu1 }
 0x4cb   :  { %v5072_v10 = vpop.f32.mrf.mxu0  ;;  %v5093_v24 = vadd.f32 %v5092_v14, %v5091_v30 }
 0x4cc   :  { %v4285_v5 = vadd.f32 %v5071_v53, %v4245_v23  ;;  %v5094_v44 = vpop.f32.mrf.mxu1 }
 0x4cd   :  { %v5073_v4 = vpop.f32.mrf.mxu0 }
 0x4ce   :  { %v4325_v57 = vadd.f32 %v5093_v24, %v4285_v5  ;;  %v5095_v61 = vpop.f32.mrf.mxu1 }
 0x4d0   :  { %v4330_v37 = vadd.f32 %v4325_v57, %v3610_v46 }
 0x4d2   :  { %v4338_v58 = vmul.f32 %v4741_v35, %v4330_v37 }
 0x4d4   :  { %v4346_v50 = vadd.f32 %v4742_v25, %v4338_v58 }
 0x4d6   :  { %v4347_v22 = vmax.f32 %v4346_v50, 0.0 }
 0x4d8   :  { %5147 = vmatmul.mubr.f32.vlgmr.msra.gmra.mxu0 %v4347_v22 }
 0x598   :  { %v4437_v3 = vpop.f32.mrf.mxu0 }
 0x599   :  { %v4438_v33 = vadd.f32 %v4743_v51, %v4437_v3 }
 0x59a   :  { %v5148_v0 = vpop.f32.mrf.mxu0 }
 0x59b   :  { %4442 = vst.msk [vmem:[#allocation4] sm:$0x3] %vm4441_vm1, %v4438_v33 }
 0x59c   :  { %5454 = shalt.err (!%p5451_p9)
}
 0x59d   :  { %4452 = dma.vmem_to_hbm [thread:$0]  %s4450_s16, 32, %s6570_s13, [#allocation5]  }
 0x59e   :  { %5465 = dma.done.wait [#allocation5], 32  }
 0x59f   :  { %5466 = vsyncadd [#allocation5], 4294967264 }
 0x5a0   :  { %4456 = vsyncpa [#allocation5], 1 }
 0x5a1   :  { %4457 = vsyncmov [#allocation3] }
 0x5a4   :  { %s4458_s12 = vpop.sfrf %4457 }
 0x5a5   :  { %p4744_p10 = scmp.ne.s32.totalorder %s4458_s12, 0 }
 0x5a7   :  { %4462 = shalt.err (%p4744_p10)  }

</bundles_post_ra>
